<compile_context>
chip_gen: v7x
topology: tpu7x:2x2x1
jax: 0.10.0
libtpu: 0.0.40
codegen_flags: <defaults>
</compile_context>

<pallas_src>
import functools

import jax
import jax.numpy as jnp
from jax.experimental import pallas as pl
from jax.experimental.pallas import tpu as pltpu


# ----------------------------------------------------------------------------- #
# Small helpers
# ----------------------------------------------------------------------------- #
def _round_up(x, m):
    return (x + m - 1) // m * m


def _pick_tile(dim, candidates):
    for c in candidates:
        if dim % c == 0:
            return c
    return None


_TM_CANDIDATES = (1024, 512, 256, 128, 64, 32, 16, 8)
_TN_CANDIDATES = (512, 256, 128)
_TK_CANDIDATES = (512, 256, 128)        # no 384: v6e/v7x MXU is 2x256^2
_VMEM_LIMIT = 48 * 1024 * 1024          # <= v7x 64 MiB physical VMEM


# ----------------------------------------------------------------------------- #
# Pallas kernels
# ----------------------------------------------------------------------------- #
def _matmul_bn_kernel(*refs, apply_relu, has_residual):
    """K-tiled matmul (bf16 in, f32 acc scratch) + bias (+residual) (+ReLU)."""
    if has_residual:
        a_ref, b_ref, bias_ref, res_ref, o_ref, acc_ref = refs
    else:
        a_ref, b_ref, bias_ref, o_ref, acc_ref = refs
        res_ref = None
    k = pl.program_id(2)

    @pl.when(k == 0)
    def _():
        acc_ref[...] = jnp.zeros_like(acc_ref)

    acc_ref[...] += jnp.dot(a_ref[...], b_ref[...],
                            preferred_element_type=jnp.float32)

    @pl.when(k == pl.num_programs(2) - 1)
    def _():
        out = acc_ref[...] + bias_ref[...]
        if has_residual:
            out = out + res_ref[...].astype(jnp.float32)
        if apply_relu:
            out = jnp.maximum(out, 0.0)
        o_ref[...] = out.astype(o_ref.dtype)


def _matmul_bn_kernel_1k(*refs, apply_relu, has_residual):
    """Single-K-step matmul: no accumulator scratch, no pl.when revisits."""
    if has_residual:
        a_ref, b_ref, bias_ref, res_ref, o_ref = refs
    else:
        a_ref, b_ref, bias_ref, o_ref = refs
        res_ref = None
    out = jnp.dot(a_ref[...], b_ref[...],
                  preferred_element_type=jnp.float32) + bias_ref[...]
    if has_residual:
        out = out + res_ref[...].astype(jnp.float32)
    if apply_relu:
        out = jnp.maximum(out, 0.0)
    o_ref[...] = out.astype(o_ref.dtype)


def _conv3x3_kernel(*args, plan, ho, wo, n_x):
    """3x3 conv (+folded BN bias, +ReLU) as 9 in-kernel shifted 1x1 matmuls.

    args = (x_ref_0, ..., x_ref_{n_x-1}, w_ref, bias_ref, o_ref)
      x refs : (1, rows, cols, Cp) padded activation (or its stride-2 phases)
      w_ref  : (9, Cp, tn) per-tap weight slabs (BN scale folded in)
      bias   : (1, tn) f32
      o_ref  : (1, ho*wo, tn)
    plan = 9 static (src_ref_index, row_offset, col_offset) taps.
    """
    x_refs = args[:n_x]
    w_ref, bias_ref, o_ref = args[n_x], args[n_x + 1], args[n_x + 2]
    cp = w_ref.shape[1]
    tn = o_ref.shape[-1]

    acc = jnp.zeros((ho * wo, tn), jnp.float32)
    for t, (s, r0, c0) in enumerate(plan):
        a = x_refs[s][0, r0:r0 + ho, c0:c0 + wo, :]
        a = a.reshape(ho * wo, cp)
        acc = acc + jnp.dot(a, w_ref[t], preferred_element_type=jnp.float32)

    out = jnp.maximum(acc + bias_ref[...], 0.0)
    o_ref[...] = out.reshape(1, ho * wo, tn).astype(o_ref.dtype)


def _maxpool_kernel(p00_ref, p01_ref, p10_ref, p11_ref, o_ref, *, ho, wo):
    """3x3/s2 max-pool over 4 phase views of the -inf padded input; tree max."""
    refs = ((p00_ref, p01_ref), (p10_ref, p11_ref))
    vals = []
    for di in range(3):
        for dj in range(3):
            r = refs[di % 2][dj % 2]
            vals.append(r[0, di // 2:di // 2 + ho, dj // 2:dj // 2 + wo, :])
    while len(vals) > 1:
        nxt = [jnp.maximum(vals[i], vals[i + 1])
               for i in range(0, len(vals) - 1, 2)]
        if len(vals) % 2:
            nxt.append(vals[-1])
        vals = nxt
    c = o_ref.shape[-1]
    o_ref[...] = vals[0].reshape(1, ho, wo, c).astype(o_ref.dtype)


# ----------------------------------------------------------------------------- #
# Kernel wrappers
# ----------------------------------------------------------------------------- #
def _matmul_bn(a, b, bias, *, relu, residual=None):
    """a:(M,K) bf16, b:(K,N) bf16 (BN scale folded), bias:(1,N) f32,
    residual:(M,N) bf16 or None."""
    M, K = a.shape
    Kb, N = b.shape
    assert K == Kb and N % 128 == 0

    Mp = _round_up(M, 8)
    if Mp != M:  # not triggered for the shapes in this script; kept for safety
        a = jnp.pad(a, ((0, Mp - M), (0, 0)))
        if residual is not None:
            residual = jnp.pad(residual, ((0, Mp - M), (0, 0)))

    tm = _pick_tile(Mp, _TM_CANDIDATES)
    tn = _pick_tile(N, _TN_CANDIDATES)
    # Whole-K (single accumulation step) whenever the A/B blocks stay small;
    # otherwise 256-multiple K tiles (avoid 384 on the 2x256^2 MXU).
    whole_k_bytes = 2 * 2 * (tm * K + K * tn)   # double-buffered bf16 A+B blocks
    if K % 128 != 0 or K <= 1024 or whole_k_bytes <= 8 * 1024 * 1024:
        tk = K
    else:
        tk = _pick_tile(K, _TK_CANDIDATES)
    ni, nj, nk = Mp // tm, N // tn, K // tk

    # Megacore (v7x dual TensorCore): make sure there are >=2 parallel blocks.
    if ni * nj == 1:
        if N >= 256 and (N // 2) % 128 == 0:
            tn, nj = N // 2, 2
        else:
            for c in _TM_CANDIDATES:
                if c < tm and c >= 16 and Mp % c == 0:
                    tm, ni = c, Mp // c
                    break

    has_res = residual is not None
    args = [a, b, bias] + ([residual] if has_res else [])
    bytes_accessed = int(a.size * 2 + b.size * 2 + bias.size * 4 + Mp * N * 2
                         + (residual.size * 2 if has_res else 0))
    cost = pl.CostEstimate(flops=2 * Mp * K * N, transcendentals=0,
                           bytes_accessed=bytes_accessed)

    if nk == 1:
        kernel = functools.partial(_matmul_bn_kernel_1k, apply_relu=relu,
                                   has_residual=has_res)
        in_specs = [
            pl.BlockSpec((tm, K), lambda i, j: (i, 0)),
            pl.BlockSpec((K, tn), lambda i, j: (0, j)),
            pl.BlockSpec((1, tn), lambda i, j: (0, j)),
        ]
        if has_res:
            in_specs.append(pl.BlockSpec((tm, tn), lambda i, j: (i, j)))
        grid_spec = pltpu.PrefetchScalarGridSpec(
            num_scalar_prefetch=0, grid=(ni, nj),
            in_specs=in_specs,
            out_specs=pl.BlockSpec((tm, tn), lambda i, j: (i, j)))
        sem = ("parallel", "parallel")
    else:
        kernel = functools.partial(_matmul_bn_kernel, apply_relu=relu,
                                   has_residual=has_res)
        in_specs = [
            pl.BlockSpec((tm, tk), lambda i, j, k: (i, k)),
            pl.BlockSpec((tk, tn), lambda i, j, k: (k, j)),
            pl.BlockSpec((1, tn), lambda i, j, k: (0, j)),
        ]
        if has_res:
            in_specs.append(pl.BlockSpec((tm, tn), lambda i, j, k: (i, j)))
        grid_spec = pltpu.PrefetchScalarGridSpec(
            num_scalar_prefetch=0, grid=(ni, nj, nk),
            in_specs=in_specs,
            out_specs=pl.BlockSpec((tm, tn), lambda i, j, k: (i, j)),
            scratch_shapes=[pltpu.VMEM((tm, tn), jnp.float32)])
        sem = ("parallel", "parallel", "arbitrary")

    out = pl.pallas_call(
        kernel,
        out_shape=jax.ShapeDtypeStruct((Mp, N), jnp.bfloat16),
        grid_spec=grid_spec,
        compiler_params=pltpu.CompilerParams(
            dimension_semantics=sem, vmem_limit_bytes=_VMEM_LIMIT),
        cost_estimate=cost,
    )(*args)
    if Mp != M:
        out = out[:M]
    return out


def _conv_im2col_bn(x_nhwc, layer, *, stride, padding, relu, residual=None):
    """Conv + folded-BN bias (+ReLU) (+fused residual) via im2col matmul.
    Used for the 7x7 stem, all 1x1 convs (no patch blow-up there) and as a
    fallback for 3x3 convs whose per-image plane would not fit in VMEM."""
    n, h, w, c = x_nhwc.shape
    kh, kw = layer["kh"], layer["kw"]
    wmat = layer["w"] if "w" in layer else layer["w9"].reshape(
        -1, layer["w9"].shape[-1])
    assert kh * kw * c == wmat.shape[0]
    ho = (h + 2 * padding - kh) // stride + 1
    wo = (w + 2 * padding - kw) // stride + 1

    if kh == 1 and kw == 1:
        a = x_nhwc if stride == 1 else x_nhwc[:, ::stride, ::stride, :]
        a = a.reshape(n * ho * wo, c)
    else:
        xp = jnp.pad(x_nhwc, ((0, 0), (padding, padding),
                              (padding, padding), (0, 0)))
        taps = [xp[:, i:i + (ho - 1) * stride + 1:stride,
                   j:j + (wo - 1) * stride + 1:stride, :]
                for i in range(kh) for j in range(kw)]
        a = jnp.stack(taps, axis=3).reshape(n * ho * wo, kh * kw * c)

    res2 = None
    if residual is not None:
        res2 = residual.reshape(n * ho * wo, residual.shape[-1])
    out = _matmul_bn(a, wmat, layer["bias"], relu=relu, residual=res2)
    return out.reshape(n, ho, wo, wmat.shape[1])


def _conv3x3_bn(x_nhwc, layer, *, stride):
    """3x3 conv + folded-BN bias + ReLU with NO im2col materialization: the
    padded activation is read once per batch element and the 9 taps are
    accumulated inside the kernel."""
    n, h, w, c = x_nhwc.shape
    w9, bias = layer["w9"], layer["bias"]
    cp, coutp = w9.shape[1], w9.shape[2]
    assert c == cp
    ho = (h + 2 - 3) // stride + 1
    wo = (w + 2 - 3) // stride + 1

    xp = jnp.pad(x_nhwc, ((0, 0), (1, 1), (1, 1), (0, 0)))
    if stride == 1:
        xs = [xp]
        plan = tuple((0, di, dj) for di in range(3) for dj in range(3))
    else:
        # Column/row phase split (~1x data) so every in-kernel tap slice is
        # unit-stride.  Tap (di, dj) lives in phase (di%2, dj%2) at offset
        # (di//2, dj//2).
        xs = [xp[:, a::2, b::2, :] for a in range(2) for b in range(2)]
        plan = tuple((2 * (di % 2) + (dj % 2), di // 2, dj // 2)
                     for di in range(3) for dj in range(3))

    # Output-channel tiling; keep >=2 parallel (j, n) blocks for megacore.
    tn = coutp
    if n * (coutp // tn) < 2 and coutp >= 256:
        tn = coutp // 2
    nj = coutp // tn

    # VMEM feasibility for the whole-plane-per-batch-element block layout.
    x_bytes = sum(a.shape[1] * a.shape[2] * a.shape[3] * 2 for a in xs)
    need = (2 * x_bytes + 2 * 9 * cp * tn * 2 + 2 * ho * wo * tn * 2
            + ho * wo * tn * 4 + 2 * ho * wo * cp * 2)
    if need > 36 * 1024 * 1024:
        # TODO(synk): tile the output rows (H) in-kernel instead of falling back.
        return _conv_im2col_bn(x_nhwc, layer, stride=stride, padding=1,
                               relu=True)

    kernel = functools.partial(_conv3x3_kernel, plan=plan, ho=ho, wo=wo,
                               n_x=len(xs))
    in_specs = ([pl.BlockSpec((1,) + a.shape[1:], lambda j, b: (b, 0, 0, 0))
                 for a in xs]
                + [pl.BlockSpec((9, cp, tn), lambda j, b: (0, 0, j)),
                   pl.BlockSpec((1, tn), lambda j, b: (0, j))])
    flops = 2 * n * ho * wo * 9 * cp * coutp
    bytes_accessed = int(n * x_bytes + 9 * cp * coutp * 2 + coutp * 4
                         + n * ho * wo * coutp * 2)

    out = pl.pallas_call(
        kernel,
        out_shape=jax.ShapeDtypeStruct((n, ho * wo, coutp), jnp.bfloat16),
        grid_spec=pltpu.PrefetchScalarGridSpec(
            num_scalar_prefetch=0,
            grid=(nj, n),                       # weights outer -> fetched once/j
            in_specs=in_specs,
            out_specs=pl.BlockSpec((1, ho * wo, tn), lambda j, b: (b, 0, j)),
        ),
        compiler_params=pltpu.CompilerParams(
            dimension_semantics=("parallel", "parallel"),
            vmem_limit_bytes=_VMEM_LIMIT),
        cost_estimate=pl.CostEstimate(flops=flops, transcendentals=0,
                                      bytes_accessed=bytes_accessed),
    )(*xs, w9, bias)
    return out.reshape(n, ho, wo, coutp)


def _maxpool_3x3_s2_p1(x_nhwc):
    """3x3/s2/p1 max-pool, fully in-kernel from 4 phase views (no 9x stack)."""
    n, h, w, c = x_nhwc.shape
    ho = (h + 2 - 3) // 2 + 1
    wo = (w + 2 - 3) // 2 + 1
    neg = jnp.asarray(jnp.finfo(x_nhwc.dtype).min, x_nhwc.dtype)
    xp = jnp.pad(x_nhwc, ((0, 0), (1, 1), (1, 1), (0, 0)), constant_values=neg)
    phases = [xp[:, a::2, b::2, :] for a in range(2) for b in range(2)]

    kernel = functools.partial(_maxpool_kernel, ho=ho, wo=wo)
    out = pl.pallas_call(
        kernel,
        out_shape=jax.ShapeDtypeStruct((n, ho, wo, c), x_nhwc.dtype),
        grid_spec=pltpu.PrefetchScalarGridSpec(
            num_scalar_prefetch=0,
            grid=(n,),
            in_specs=[pl.BlockSpec((1,) + p.shape[1:], lambda b: (b, 0, 0, 0))
                      for p in phases],
            out_specs=pl.BlockSpec((1, ho, wo, c), lambda b: (b, 0, 0, 0)),
        ),
        compiler_params=pltpu.CompilerParams(
            dimension_semantics=("parallel",),
            vmem_limit_bytes=_VMEM_LIMIT),
    )(*phases)
    return out


# ----------------------------------------------------------------------------- #
# Deterministic parameter construction (ResNet-50: bottleneck, blocks [3,4,6,3]).
# All weight-side work (transpose, channel padding, BN scale folding, bf16 cast)
# happens once here, never per forward call.
# ----------------------------------------------------------------------------- #
_BN_EPS = 1e-5


def _init_conv_bn(key, cout, cin, kh, kw, pad_cin=True):
    kc, k1, k2, k3, k4 = jax.random.split(key, 5)
    fan_in = cin * kh * kw
    w = jax.random.normal(kc, (cout, cin, kh, kw), jnp.float32) * (2.0 / fan_in) ** 0.5
    gamma = jax.random.uniform(k1, (cout,), jnp.float32, 0.5, 1.0)
    beta = jax.random.normal(k2, (cout,), jnp.float32) * 0.01
    mean = jax.random.normal(k3, (cout,), jnp.float32) * 0.01
    var = jax.random.uniform(k4, (cout,), jnp.float32, 0.5, 1.5)
    scale = gamma / jnp.sqrt(var + _BN_EPS)          # eval-mode BN
    bias = beta - mean * scale

    cin_p = _round_up(cin, 128) if pad_cin else cin
    cout_p = _round_up(cout, 128)
    # OIHW -> (kh, kw, cin, cout); fold the BN scale into the weight columns;
    # zero-pad channels to lane-friendly sizes; cast to bf16.  Padded output
    # channels have zero weights AND zero bias, so they stay exactly 0.
    b = jnp.transpose(w, (2, 3, 1, 0)) * scale[None, None, None, :]
    b = jnp.pad(b, ((0, 0), (0, 0), (0, cin_p - cin), (0, cout_p - cout)))
    b = b.astype(jnp.bfloat16)
    bias = jnp.pad(bias, (0, cout_p - cout)).reshape(1, cout_p)

    layer = {"bias": bias, "kh": kh, "kw": kw}
    if kh == 3 and kw == 3:
        layer["w9"] = b.reshape(9, cin_p, cout_p)     # per-tap (Cin, Cout) slabs
    else:
        layer["w"] = b.reshape(kh * kw * cin_p, cout_p)
    return layer


def _init_bottleneck(key, inplanes, planes, stride, has_downsample):
    k1, k2, k3, k4 = jax.random.split(key, 4)
    p = {
        "conv1": _init_conv_bn(k1, planes, inplanes, 1, 1),
        "conv2": _init_conv_bn(k2, planes, planes, 3, 3),
        "conv3": _init_conv_bn(k3, planes * 4, planes, 1, 1),
        "stride": stride,
    }
    if has_downsample:
        p["downsample"] = _init_conv_bn(k4, planes * 4, inplanes, 1, 1)
    return p


def init_resnet50_params(key):
    k_stem, key = jax.random.split(key)
    params = {"stem": _init_conv_bn(k_stem, 64, 3, 7, 7, pad_cin=False),
              "stages": []}
    stage_cfg = [(64, 3, 1), (128, 4, 2), (256, 6, 2), (512, 3, 2)]
    inplanes = 64
    for planes, nblocks, stride in stage_cfg:
        blocks = []
        for bi in range(nblocks):
            key, bk = jax.random.split(key)
            blk_stride = stride if bi == 0 else 1
            has_ds = (bi == 0)   # first block of every RN50 stage changes shape
            blocks.append(_init_bottleneck(bk, inplanes, planes, blk_stride, has_ds))
            inplanes = planes * 4
        params["stages"].append(blocks)
    return params


# ----------------------------------------------------------------------------- #
# Forward pass (mmcv base ResNet(depth=50): 7x7 stem, pytorch-style bottleneck
# with stride on the 3x3 conv, eval-mode BN, returns per-stage features)
# ----------------------------------------------------------------------------- #
def _bottleneck_forward(p, x):
    out = _conv_im2col_bn(x, p["conv1"], stride=1, padding=0, relu=True)
    out = _conv3x3_bn(out, p["conv2"], stride=p["stride"])
    if "downsample" in p:
        identity = _conv_im2col_bn(x, p["downsample"], stride=p["stride"],
                                   padding=0, relu=False)
    else:
        identity = x
    # Residual add + final ReLU are fused into the conv3 matmul epilogue.
    return _conv_im2col_bn(out, p["conv3"], stride=1, padding=0, relu=True,
                           residual=identity)


def res_model_forward(params, x_nchw):
    """Equivalent of ResModel.forward: returns the tuple of stage feature maps."""
    x = jnp.transpose(x_nchw, (0, 2, 3, 1)).astype(jnp.bfloat16)   # NCHW -> NHWC
    x = _conv_im2col_bn(x, params["stem"], stride=2, padding=3, relu=True)
    x = _maxpool_3x3_s2_p1(x)
    outs = []
    for blocks in params["stages"]:
        for blk in blocks:
            x = _bottleneck_forward(blk, x)
        # Stage outputs (256/512/1024/2048 channels, never channel-padded),
        # returned in NCHW / f32 like the PyTorch module.
        outs.append(jnp.transpose(x, (0, 3, 1, 2)).astype(jnp.float32))
    return tuple(outs)


# ----------------------------------------------------------------------------- #
if __name__ == "__main__":
    key = jax.random.PRNGKey(0)
    k_params, k_x = jax.random.split(key)

    params = init_resnet50_params(k_params)
    # Small input consistent with the module: NCHW, 3 input channels.
    x = jax.random.normal(k_x, (2, 3, 64, 64), jnp.float32)

    feats = res_model_forward(params, x)
    feats = jax.block_until_ready(feats)

    expected = [(2, 256, 16, 16), (2, 512, 8, 8), (2, 1024, 4, 4), (2, 2048, 2, 2)]
    assert [tuple(f.shape) for f in feats] == expected
    assert all(bool(jnp.all(jnp.isfinite(f))) for f in feats)
    print("KERNEL_OK")
</pallas_src>

<mosaic_0001>
module attributes {stable_mosaic.version = 11 : i64} {
  func.func @_matmul_bn_kernel_1k(%arg0: i32, %arg1: i32, %arg2: memref<1024x147xbf16, #tpu.memory_space<vmem>>, %arg3: memref<147x128xbf16, #tpu.memory_space<vmem>>, %arg4: memref<1x128xf32, #tpu.memory_space<vmem>>, %arg5: memref<1024x128xbf16, #tpu.memory_space<vmem>>) attributes {dimension_semantics = [#tpu.dimension_semantics<parallel>, #tpu.dimension_semantics<parallel>], iteration_bounds = array<i64: 2, 1>, scalar_prefetch = 0 : i64, scratch_operands = 0 : i64, tpu.core_type = #tpu.core_type<tc>, window_params = [{transform_indices = @transform_0, window_bounds = array<i64: 1024, 147>}, {transform_indices = @transform_1, window_bounds = array<i64: 147, 128>}, {transform_indices = @transform_2, window_bounds = array<i64: 1, 128>}, {transform_indices = @transform_3, window_bounds = array<i64: 1024, 128>}]} {
    %c0 = arith.constant 0 : index
    %c0_0 = arith.constant 0 : index
    %0 = vector.load %arg2[%c0, %c0_0] : memref<1024x147xbf16, #tpu.memory_space<vmem>>, vector<1024x147xbf16>
    %c0_1 = arith.constant 0 : index
    %c0_2 = arith.constant 0 : index
    %1 = vector.load %arg3[%c0_1, %c0_2] : memref<147x128xbf16, #tpu.memory_space<vmem>>, vector<147x128xbf16>
    %cst = arith.constant dense<0.000000e+00> : vector<1024x128xf32>
    %2 = tpu.matmul %0, %1, %cst {dimension_numbers = #tpu.dot_dimension_numbers<[1], [0], [0], [1], [0, 0, 1, 1], [], []>} : vector<1024x147xbf16>, vector<147x128xbf16>, vector<1024x128xf32> -> vector<1024x128xf32>
    %c0_3 = arith.constant 0 : index
    %c0_4 = arith.constant 0 : index
    %3 = vector.load %arg4[%c0_3, %c0_4] : memref<1x128xf32, #tpu.memory_space<vmem>>, vector<1x128xf32>
    %4 = vector.broadcast %3 : vector<1x128xf32> to vector<1024x128xf32>
    %5 = arith.addf %2, %4 : vector<1024x128xf32>
    %cst_5 = arith.constant 0.000000e+00 : f32
    %6 = vector.broadcast %cst_5 : f32 to vector<1024x128xf32>
    %7 = arith.maximumf %5, %6 : vector<1024x128xf32>
    %8 = arith.truncf %7 : vector<1024x128xf32> to vector<1024x128xbf16>
    %c0_6 = arith.constant 0 : index
    %c0_7 = arith.constant 0 : index
    %9 = vector.load %arg5[%c0_6, %c0_7] : memref<1024x128xbf16, #tpu.memory_space<vmem>>, vector<1024x128xbf16>
    tpu.vector_store %arg5[%c0_6, %c0_7], %8 {strides = array<i32>} : memref<1024x128xbf16, #tpu.memory_space<vmem>>, vector<1024x128xbf16>,
    return
  }
  func.func @transform_0(%arg0: i32, %arg1: i32) -> (i32, i32) {
    %c0_i32 = arith.constant 0 : i32
    %c0_i32_0 = arith.constant 0 : i32
    return %arg0, %c0_i32 : i32, i32
  }
  func.func @transform_1(%arg0: i32, %arg1: i32) -> (i32, i32) {
    %c0_i32 = arith.constant 0 : i32
    %c0_i32_0 = arith.constant 0 : i32
    return %c0_i32, %arg1 : i32, i32
  }
  func.func @transform_2(%arg0: i32, %arg1: i32) -> (i32, i32) {
    %c0_i32 = arith.constant 0 : i32
    %c0_i32_0 = arith.constant 0 : i32
    return %c0_i32, %arg1 : i32, i32
  }
  func.func @transform_3(%arg0: i32, %arg1: i32) -> (i32, i32) {
    %c0_i32 = arith.constant 0 : i32
    return %arg0, %arg1 : i32, i32
  }
}

</mosaic_0001>

<bundles_post_ra>
// kernel: tpu_custom_call.1
= control target key start
LH: loop header
LB: loop body
LE: loop exit
PB: predicated region body
PF: predicated region fallthrough
CT: control target
= control target key end

     0   :  { %8 = vsyncpa [#allocation3], 0  ;;  %s4429_s0 = inlined_call_operand.vmem [shape: bf16[2048,147], index: 0, kind: input, shape index: {}]   ;;  %s4430_s1 = inlined_call_operand.vmem [shape: bf16[147,128], index: 1, kind: input, shape index: {}]   ;;  %s4431_s2 = inlined_call_operand.vmem [shape: f32[1,128], index: 2, kind: input, shape index: {}]   ;;  %s4432_s3 = inlined_call_operand.hbm [shape: bf16[2048,128], index: 3, kind: output, shape index: {}]  }
   0x1   :  { %10 = vsyncpa [#allocation3 + $0x1], 0  ;;  %s3882_s12 = smov 0   ;;  %s3884_s13 = smov 0  }
   0x2   :  { %s3886_s14 = smov 0   ;;  %s3888_s15 = smov 0  }
   0x3   :  { %s3890_s16 = smov 0   ;;  %s3892_s17 = smov 0  }
   0x4 LB: > { %s2635_s18 = sadd.s32 4294967295, %s3855_s17   ;;  %s2636_s19 = sadd.s32 4294967294, %s3855_s17   ;;  %s3855_s17 = sphi %s3892_s17, %s16_s17   ;;  %s3851_s16 = sphi %s3890_s16, %s4439_s16   ;;  %s3847_s15 = sphi %s3888_s15, %s4438_s15   ;;  %s3843_s14 = sphi %s3886_s14, %s4437_s14   ;;  %s3839_s13 = sphi %s3884_s13, %s4436_s13   ;;  %s3835_s12 = sphi %s3882_s12, %s4435_s12  }
   0x5   : > { %s28_s20 = sadd.s32 1, %s3851_s16  ;;  %s115_s21 = sadd.s32 1, %s3843_s14 }
   0x6   : > { %p30_p0 = scmp.ge.s32.totalorder %s28_s20, 2  ;;  %p125_p1 = scmp.ne.s32.totalorder %s3843_s14, %s3839_s13 }
   0x7   : > { %p126_p2 = scmp.eq.s32.totalorder %s2635_s18, 1  ;;  %p131_p3 = scmp.ne.s32.totalorder %s3839_s13, %s3835_s12 }
   0x8   : > { %s4441_s20 = smov (%p30_p0, %s28_s20), 0  ;;  %p132_p5 = scmp.eq.s32.totalorder %s2636_s19, 1 }
   0x9   : > { %p3922_p4 = por %p126_p2, %p125_p1  ;;  %s110_s23 = ssub.s32 %s3851_s16, %s4441_s20 }
   0xa   : > { %p2641_p6 = scmp.ge.s32.totalorder %s3855_s17, 1  ;;  %p113_p7 = scmp.eq.s32.totalorder %s110_s23, 0 }
   0xb   : > { %p3929_p8 = por %p132_p5, %p131_p3  ;;  %p173_p9 = scmp.lt.s32.totalorder %s3855_s17, 3 }
   0xc   : > { %s3935_s25 = scalar_select %p113_p7, %s3843_s14, %s115_s21  }
   0xd   : > { %p174_p10 = pnand %p2641_p6, %p173_p9 }
   0xe   : > { %v3574_v0 = vld [vmem:[%s4430_s1] sm:$0xff] (!%p174_p10)   ;;  %v3857_v1 = vmov (!%p174_p10), 0   ;;  %v3575_v2 = vld [vmem:[%s4430_s1 + $0x8] sm:$0xff] (!%p174_p10)   ;;  %v3576_v3 = vld [vmem:[%s4430_s1 + $0x10] sm:$0xff] (!%p174_p10)   ;;  %s2643_s5 = sshll.u32 (!%p174_p10), %s3847_s15, 7  ;;  %vm1008_vm0 = vcmask (!%p174_p10), 154624  }
   0xf   : > { %177 = sbr.rel (%p174_p10) target bundleno = 538 (0x21a), region = 32  ;;  %1208 = vmatprep.subr.bf16.mxu0 (!%p174_p10), %v3857_v1  ;;  %3495 = vmatprep.subr.bf16.mxu1 (!%p174_p10), %v3857_v1  ;;  %p206_p11 = scmp.lt.s32.totalorder (!%p174_p10), %s2643_s5, 255  ;;  %v3577_v4 = vld [vmem:[%s4430_s1 + $0x18] sm:$0xff] (!%p174_p10)   ;;  %v3578_v5 = vld [vmem:[%s4430_s1 + $0x20] sm:$0xff] (!%p174_p10)   ;;  %v3579_v8 = vld [vmem:[%s4430_s1 + $0x28] sm:$0xff] (!%p174_p10)   ;;  %vm1201_vm1 = vcmask (!%p174_p10), 1040384  }
  0x10   : > { %1209 = vmatpush1.bf16.msra.mxu0 (!%p174_p10), %v3574_v0  ;;  %3505 = vmatpush1.bf16.msra.mxu1 (!%p174_p10), %v3574_v0  ;;  %v3580_v9 = vld [vmem:[%s4430_s1 + $0x30] sm:$0xff] (!%p174_p10)   ;;  %v3581_v10 = vld [vmem:[%s4430_s1 + $0x38] sm:$0xff] (!%p174_p10)   ;;  %vm1202_vm2 = vcmask (!%p174_p10), 1041408   ;;  %v3858_v11 = vmov (!%p174_p10), 65535   ;;  %v3582_v13 = vld [vmem:[%s4430_s1 + $0x40] sm:$0xff] (!%p174_p10)   ;;  %s202_s9 = sand.u32 (!%p174_p10), 1, %s3839_s13  }
  0x11   : > { %1210 = vmatprep.subr.bf16.mxu0 (!%p174_p10), %v3857_v1  ;;  %3496 = vmatprep.subr.bf16.mxu1 (!%p174_p10), %v3857_v1  ;;  %v1203_v12 = vsel (!%p174_p10), %vm1201_vm1, 4294967295, %v3858_v11  ;;  %v3583_v14 = vld [vmem:[%s4430_s1 + $0x48] ss:$0 sps:$4 sm:$0x33] (!%p174_p10)   ;;  %s2642_s10 = sshll.u32 (!%p174_p10), %s202_s9, 9  ;;  %s3111_s21 = sshll.u32 (!%p174_p10), %s3847_s15, 13 }
  0x12   : > { %v1204_v15 = vsel (!%p174_p10), %vm1202_vm2, %v1203_v12, 0  ;;  %s4157_s18 = scalar_lea.vmem (!%p174_p10), [#allocation2], %s2642_s10  ;;  %s4375_s28 = scalar_lea.hbm (!%p174_p10), %s4432_s3, %s3111_s21 }
  0x13   : > { %v1206_v16 = vand.u32 (!%p174_p10), %v3583_v14, %v1204_v15  ;;  %s2536_s23 = sshll.u32 (!%p174_p10), %s4157_s18, 4  ;;  %s4383_s15 = scalar_lea.sflag (!%p174_p10), [#allocation3], %s202_s9  ;;  %s4377_s23 = int_to_ptr.vmem [resolvable:$true] %s2536_s23 }
  0x14   : > { %1211 = vmatpush1.bf16.msra.mxu0 (!%p174_p10), %v3575_v2  ;;  %3506 = vmatpush1.bf16.msra.mxu1 (!%p174_p10), %v3575_v2  ;;  %s3777_s29 = scalar_lea.vmem (!%p174_p10), %s4377_s23, 8192  ;;  %s3859_s30 = smov (!%p174_p10), [#allocation2]  }
  0x15   : > { %1212 = vmatprep.subr.bf16.mxu0 (!%p174_p10), %v3857_v1  ;;  %3497 = vmatprep.subr.bf16.mxu1 (!%p174_p10), %v3857_v1  ;;  %p3778_p12 = scmp.ne.s32.totalorder (!%p174_p10), %s4377_s23, %s3777_s29  ;;  %s3781_s4 = sshll.u32 (!%p174_p10), %s3859_s30, 4  ;;  %s3782_s4 = int_to_ptr.vmem [resolvable:$false] %s3781_s4 }
  0x16   : > { %s4443_s5 = smov (!%p206_p11, %s2643_s5), 255  ;;  %p3784_p1 = scmp.lt.s32.totalorder %s4377_s23, %s3782_s4 }
  0x17   : > { %s2982_s8 = sshll.u32 %s4443_s5, 3  ;;  %p3779_p13 = pnand %p3778_p12, %p3922_p4 }
  0x18   : > { %1213 = vmatpush1.bf16.msra.mxu0 %v3576_v3  ;;  %3507 = vmatpush1.bf16.msra.mxu1 %v3576_v3  ;;  %s3953_s11 = scalar_lea.vmem %s4429_s0, %s2982_s8  ;;  %s3783_s5 = scalar_lea.vmem %s3782_s4, 16384 }
  0x19   : > { %1214 = vmatprep.subr.bf16.mxu0 %v3857_v1  ;;  %3498 = vmatprep.subr.bf16.mxu1 %v3857_v1  ;;  %v3586_v6 = vld [vmem:[%s3953_s11 + $0x4] ss:$8 sps:$4 sm:$0xff]   ;;  %v3584_v17 = vld [vmem:[%s3953_s11] ss:$8 sps:$4 sm:$0xff]   ;;  %v3590_v19 = vld [vmem:[%s3953_s11 + $0x14] ss:$8 sps:$4 sm:$0xff]   ;;  %p3780_p0 = pneg %p3779_p13  ;;  %p3785_p2 = scmp.lt.s32.totalorder %s3783_s5, %s3777_s29 }
  0x1a   : > { %v3589_v7 = vld [vmem:[%s3953_s11 + $0x204] ss:$8 sps:$4 sm:$0xff]   ;;  %2785 = vmatprep.mubr.msk.bf16.mxu0 %vm1008_vm0, %v3586_v6  ;;  %v3587_v18 = vld [vmem:[%s3953_s11 + $0x200] ss:$8 sps:$4 sm:$0xff]   ;;  %v3592_v20 = vld [vmem:[%s3953_s11 + $0x214] ss:$8 sps:$4 sm:$0xff]  }
  0x1b   : > { %2817 = vmatprep.mubr.msk.bf16.mxu1 %vm1008_vm0, %v3589_v7  ;;  %v3594_v21 = vld [vmem:[%s3953_s11 + $0x10] ss:$8 sps:$4 sm:$0xff]   ;;  %v3596_v23 = vld [vmem:[%s3953_s11 + $0x24] ss:$8 sps:$4 sm:$0xff]   ;;  %v3600_v25 = vld [vmem:[%s3953_s11 + $0x20] ss:$8 sps:$4 sm:$0xff]   ;;  %p3786_p3 = por %p3785_p2, %p3784_p1 }
  0x1c   : > { %1215 = vmatpush1.bf16.msra.mxu0 %v3577_v4  ;;  %3508 = vmatpush1.bf16.msra.mxu1 %v3577_v4  ;;  %v3595_v22 = vld [vmem:[%s3953_s11 + $0x210] ss:$8 sps:$4 sm:$0xff]   ;;  %v3598_v24 = vld [vmem:[%s3953_s11 + $0x224] ss:$8 sps:$4 sm:$0xff]   ;;  %v3601_v26 = vld [vmem:[%s3953_s11 + $0x220] ss:$8 sps:$4 sm:$0xff]  }
  0x1d   : > { %1216 = vmatprep.subr.bf16.mxu0 %v3857_v1  ;;  %3499 = vmatprep.subr.bf16.mxu1 %v3857_v1  ;;  %v3602_v27 = vld [vmem:[%s3953_s11 + $0x34] ss:$8 sps:$4 sm:$0xff]   ;;  %v3606_v29 = vld [vmem:[%s3953_s11 + $0x30] ss:$8 sps:$4 sm:$0xff]   ;;  %v3608_v31 = vld [vmem:[%s3953_s11 + $0x44] ss:$8 sps:$4 sm:$0xff]   ;;  %p3787_p5 = pnand %p3786_p3, %p3780_p0 }
  0x1e   : > { %v3604_v28 = vld [vmem:[%s3953_s11 + $0x234] ss:$8 sps:$4 sm:$0xff]   ;;  %v3607_v30 = vld [vmem:[%s3953_s11 + $0x230] ss:$8 sps:$4 sm:$0xff]   ;;  %v3610_v32 = vld [vmem:[%s3953_s11 + $0x244] ss:$8 sps:$4 sm:$0xff]  }
  0x1f   : > { %v3612_v33 = vld [vmem:[%s3953_s11 + $0x40] ss:$8 sps:$4 sm:$0xff]   ;;  %v3614_v35 = vld [vmem:[%s3953_s11 + $0x54] ss:$8 sps:$4 sm:$0xff]   ;;  %v3618_v37 = vld [vmem:[%s3953_s11 + $0x50] ss:$8 sps:$4 sm:$0xff]  }
  0x20   : > { %1217 = vmatpush1.bf16.msra.mxu0 %v3578_v5  ;;  %3509 = vmatpush1.bf16.msra.mxu1 %v3578_v5  ;;  %v3613_v34 = vld [vmem:[%s3953_s11 + $0x240] ss:$8 sps:$4 sm:$0xff]   ;;  %v3616_v36 = vld [vmem:[%s3953_s11 + $0x254] ss:$8 sps:$4 sm:$0xff]   ;;  %v3619_v38 = vld [vmem:[%s3953_s11 + $0x250] ss:$8 sps:$4 sm:$0xff]  }
  0x21   : > { %1218 = vmatprep.subr.bf16.mxu0 %v3857_v1  ;;  %3500 = vmatprep.subr.bf16.mxu1 %v3857_v1  ;;  %v3620_v39 = vld [vmem:[%s3953_s11 + $0x64] ss:$8 sps:$4 sm:$0xff]   ;;  %v3624_v41 = vld [vmem:[%s3953_s11 + $0x60] ss:$8 sps:$4 sm:$0xff]   ;;  %v3626_v43 = vld [vmem:[%s3953_s11 + $0x74] ss:$8 sps:$4 sm:$0xff]  }
  0x22   : > { %v3622_v40 = vld [vmem:[%s3953_s11 + $0x264] ss:$8 sps:$4 sm:$0xff]   ;;  %v3625_v42 = vld [vmem:[%s3953_s11 + $0x260] ss:$8 sps:$4 sm:$0xff]   ;;  %v3628_v44 = vld [vmem:[%s3953_s11 + $0x274] ss:$8 sps:$4 sm:$0xff]  }
  0x23   : > { %v3630_v45 = vld [vmem:[%s3953_s11 + $0x70] ss:$8 sps:$4 sm:$0xff]   ;;  %v3632_v47 = vld [vmem:[%s3953_s11 + $0x84] ss:$8 sps:$4 sm:$0xff]   ;;  %v3636_v49 = vld [vmem:[%s3953_s11 + $0x80] ss:$8 sps:$4 sm:$0xff]  }
  0x24   : > { %1219 = vmatpush1.bf16.msra.mxu0 %v3579_v8  ;;  %3510 = vmatpush1.bf16.msra.mxu1 %v3579_v8  ;;  %v3631_v46 = vld [vmem:[%s3953_s11 + $0x270] ss:$8 sps:$4 sm:$0xff]   ;;  %v3634_v48 = vld [vmem:[%s3953_s11 + $0x284] ss:$8 sps:$4 sm:$0xff]   ;;  %v3637_v50 = vld [vmem:[%s3953_s11 + $0x280] ss:$8 sps:$4 sm:$0xff]  }
  0x25   : > { %1220 = vmatprep.subr.bf16.mxu0 %v3857_v1  ;;  %3501 = vmatprep.subr.bf16.mxu1 %v3857_v1  ;;  %v3638_v51 = vld [vmem:[%s3953_s11 + $0x94] ss:$8 sps:$4 sm:$0xff]   ;;  %v3642_v53 = vld [vmem:[%s3953_s11 + $0x90] ss:$8 sps:$4 sm:$0xff]   ;;  %v3644_v55 = vld [vmem:[%s3953_s11 + $0xa4] ss:$8 sps:$4 sm:$0xff]  }
  0x26   : > { %v3640_v52 = vld [vmem:[%s3953_s11 + $0x294] ss:$8 sps:$4 sm:$0xff]   ;;  %v3643_v54 = vld [vmem:[%s3953_s11 + $0x290] ss:$8 sps:$4 sm:$0xff]   ;;  %v3646_v56 = vld [vmem:[%s3953_s11 + $0x2a4] ss:$8 sps:$4 sm:$0xff]  }
  0x27   : > { %v3648_v57 = vld [vmem:[%s3953_s11 + $0xa0] ss:$8 sps:$4 sm:$0xff]   ;;  %v3650_v59 = vld [vmem:[%s3953_s11 + $0xb4] ss:$8 sps:$4 sm:$0xff]   ;;  %v3654_v61 = vld [vmem:[%s3953_s11 + $0xb0] ss:$8 sps:$4 sm:$0xff]  }
  0x28   : > { %1221 = vmatpush1.bf16.msra.mxu0 %v3580_v9  ;;  %3511 = vmatpush1.bf16.msra.mxu1 %v3580_v9  ;;  %v3649_v58 = vld [vmem:[%s3953_s11 + $0x2a0] ss:$8 sps:$4 sm:$0xff]   ;;  %v3652_v60 = vld [vmem:[%s3953_s11 + $0x2b4] ss:$8 sps:$4 sm:$0xff]   ;;  %v3655_v62 = vld [vmem:[%s3953_s11 + $0x2b0] ss:$8 sps:$4 sm:$0xff]  }
  0x29   : > { %1222 = vmatprep.subr.bf16.mxu0 %v3857_v1  ;;  %3502 = vmatprep.subr.bf16.mxu1 %v3857_v1  ;;  %v3656_v63 = vld [vmem:[%s3953_s11 + $0xc4] ss:$8 sps:$4 sm:$0xff]   ;;  %v3661_v2 = vld [vmem:[%s3953_s11 + $0x2c0] ss:$8 sps:$4 sm:$0xff]   ;;  %v3662_v3 = vld [vmem:[%s3953_s11 + $0xd4] ss:$8 sps:$4 sm:$0xff]  }
  0x2a   : > { %v3658_v0 = vld [vmem:[%s3953_s11 + $0x2c4] ss:$8 sps:$4 sm:$0xff]   ;;  %v3664_v4 = vld [vmem:[%s3953_s11 + $0x2d4] ss:$8 sps:$4 sm:$0xff]   ;;  %v3666_v5 = vld [vmem:[%s3953_s11 + $0xd0] ss:$8 sps:$4 sm:$0xff]  }
  0x2b   : > { %v3667_v6 = vld [vmem:[%s3953_s11 + $0x2d0] ss:$8 sps:$4 sm:$0xff]   ;;  %v3668_v7 = vld [vmem:[%s3953_s11 + $0xe4] ss:$8 sps:$4 sm:$0xff]   ;;  %v3672_v9 = vld [vmem:[%s3953_s11 + $0xe0] ss:$8 sps:$4 sm:$0xff]  }
  0x2c   : > { %1223 = vmatpush1.bf16.msra.mxu0 %v3581_v10  ;;  %3512 = vmatpush1.bf16.msra.mxu1 %v3581_v10  ;;  %v3670_v8 = vld [vmem:[%s3953_s11 + $0x2e4] ss:$8 sps:$4 sm:$0xff]   ;;  %v3673_v10 = vld [vmem:[%s3953_s11 + $0x2e0] ss:$8 sps:$4 sm:$0xff]   ;;  %v3674_v11 = vld [vmem:[%s3953_s11 + $0xf4] ss:$8 sps:$4 sm:$0xff]  }
  0x2d   : > { %1224 = vmatprep.subr.bf16.mxu0 %v3857_v1  ;;  %3503 = vmatprep.subr.bf16.mxu1 %v3857_v1  ;;  %v3676_v12 = vld [vmem:[%s3953_s11 + $0x2f4] ss:$8 sps:$4 sm:$0xff]   ;;  %v3679_v14 = vld [vmem:[%s3953_s11 + $0x2f0] ss:$8 sps:$4 sm:$0xff]   ;;  %v3680_v15 = vld [vmem:[%s3953_s11 + $0x104] ss:$8 sps:$4 sm:$0xff]  }
  0x30   : > { %1225 = vmatpush1.bf16.msra.mxu0 %v3582_v13  ;;  %3513 = vmatpush1.bf16.msra.mxu1 %v3582_v13  ;;  %v3678_v13 = vld [vmem:[%s3953_s11 + $0xf0] ss:$8 sps:$4 sm:$0xff]  }
  0x31   : > { %1226 = vmatprep.subr.bf16.mxu0 %v3857_v1  ;;  %3504 = vmatprep.subr.bf16.mxu1 %v3857_v1  ;;  %v3660_v1 = vld [vmem:[%s3953_s11 + $0xc0] ss:$8 sps:$4 sm:$0xff]  }
  0x34   : > { %1227 = vmatpush1.bf16.msra.mxu0 %v1206_v16  ;;  %3514 = vmatpush1.bf16.msra.mxu1 %v1206_v16  ;;  %v3682_v16 = vld [vmem:[%s3953_s11 + $0x304] ss:$8 sps:$4 sm:$0xff]  }
  0x37   : > { %1241 = vmatmul.mubr.bf16.vlgmr.msra.gmra.mrb[0].mxu0 %v3584_v17  ;;  %1497 = vmatmul.mubr.bf16.vlgmr.msra.gmra.mrb[0].mxu1 %v3587_v18  ;;  %v3684_v17 = vld [vmem:[%s3953_s11 + $0x100] ss:$8 sps:$4 sm:$0xff]  }
  0x38   : > { %2786 = vmatprep.mubr.msk.bf16.mxu0 %vm1008_vm0, %v3590_v19  ;;  %2818 = vmatprep.mubr.msk.bf16.mxu1 %vm1008_vm0, %v3592_v20  ;;  %v3685_v18 = vld [vmem:[%s3953_s11 + $0x300] ss:$8 sps:$4 sm:$0xff]   ;;  %v3686_v19 = vld [vmem:[%s3953_s11 + $0x114] ss:$8 sps:$4 sm:$0xff]  }
  0x39   : > { %v3688_v20 = vld [vmem:[%s3953_s11 + $0x314] ss:$8 sps:$4 sm:$0xff]  }
  0x3f   : > { %1249 = vmatmul.mubr.bf16.gmra.mrb[4].mxu0 %v3594_v21  ;;  %1505 = vmatmul.mubr.bf16.gmra.mrb[4].mxu1 %v3595_v22  ;;  %v3690_v21 = vld [vmem:[%s3953_s11 + $0x110] ss:$8 sps:$4 sm:$0xff]  }
  0x40   : > { %2787 = vmatprep.mubr.msk.bf16.mxu0 %vm1008_vm0, %v3596_v23  ;;  %2819 = vmatprep.mubr.msk.bf16.mxu1 %vm1008_vm0, %v3598_v24  ;;  %v3691_v22 = vld [vmem:[%s3953_s11 + $0x310] ss:$8 sps:$4 sm:$0xff]   ;;  %v3692_v23 = vld [vmem:[%s3953_s11 + $0x124] ss:$8 sps:$4 sm:$0xff]  }
  0x41   : > { %v3694_v24 = vld [vmem:[%s3953_s11 + $0x324] ss:$8 sps:$4 sm:$0xff]  }
  0x47   : > { %1257 = vmatmul.mubr.bf16.gmra.mrb[8].mxu0 %v3600_v25  ;;  %1513 = vmatmul.mubr.bf16.gmra.mrb[8].mxu1 %v3601_v26  ;;  %v3696_v25 = vld [vmem:[%s3953_s11 + $0x120] ss:$8 sps:$4 sm:$0xff]  }
  0x48   : > { %2788 = vmatprep.mubr.msk.bf16.mxu0 %vm1008_vm0, %v3602_v27  ;;  %2820 = vmatprep.mubr.msk.bf16.mxu1 %vm1008_vm0, %v3604_v28  ;;  %v3697_v26 = vld [vmem:[%s3953_s11 + $0x320] ss:$8 sps:$4 sm:$0xff]   ;;  %v3698_v27 = vld [vmem:[%s3953_s11 + $0x134] ss:$8 sps:$4 sm:$0xff]  }
  0x49   : > { %v3700_v28 = vld [vmem:[%s3953_s11 + $0x334] ss:$8 sps:$4 sm:$0xff]  }
  0x4f   : > { %1265 = vmatmul.mubr.bf16.gmra.mrb[12].mxu0 %v3606_v29  ;;  %1521 = vmatmul.mubr.bf16.gmra.mrb[12].mxu1 %v3607_v30  ;;  %v3702_v29 = vld [vmem:[%s3953_s11 + $0x130] ss:$8 sps:$4 sm:$0xff]  }
  0x50   : > { %2789 = vmatprep.mubr.msk.bf16.mxu0 %vm1008_vm0, %v3608_v31  ;;  %2821 = vmatprep.mubr.msk.bf16.mxu1 %vm1008_vm0, %v3610_v32  ;;  %v3703_v30 = vld [vmem:[%s3953_s11 + $0x330] ss:$8 sps:$4 sm:$0xff]   ;;  %v3704_v31 = vld [vmem:[%s3953_s11 + $0x144] ss:$8 sps:$4 sm:$0xff]  }
  0x51   : > { %v3706_v32 = vld [vmem:[%s3953_s11 + $0x344] ss:$8 sps:$4 sm:$0xff]  }
  0x57   : > { %1273 = vmatmul.mubr.bf16.gmra.mrb[16].mxu0 %v3612_v33  ;;  %1529 = vmatmul.mubr.bf16.gmra.mrb[16].mxu1 %v3613_v34  ;;  %v3708_v33 = vld [vmem:[%s3953_s11 + $0x140] ss:$8 sps:$4 sm:$0xff]  }
  0x58   : > { %2790 = vmatprep.mubr.msk.bf16.mxu0 %vm1008_vm0, %v3614_v35  ;;  %2822 = vmatprep.mubr.msk.bf16.mxu1 %vm1008_vm0, %v3616_v36  ;;  %v3709_v34 = vld [vmem:[%s3953_s11 + $0x340] ss:$8 sps:$4 sm:$0xff]   ;;  %v3710_v35 = vld [vmem:[%s3953_s11 + $0x154] ss:$8 sps:$4 sm:$0xff]  }
  0x59   : > { %v3712_v36 = vld [vmem:[%s3953_s11 + $0x354] ss:$8 sps:$4 sm:$0xff]  }
  0x5f   : > { %1281 = vmatmul.mubr.bf16.gmra.mrb[20].mxu0 %v3618_v37  ;;  %1537 = vmatmul.mubr.bf16.gmra.mrb[20].mxu1 %v3619_v38  ;;  %v3714_v37 = vld [vmem:[%s3953_s11 + $0x150] ss:$8 sps:$4 sm:$0xff]  }
  0x60   : > { %2791 = vmatprep.mubr.msk.bf16.mxu0 %vm1008_vm0, %v3620_v39  ;;  %2823 = vmatprep.mubr.msk.bf16.mxu1 %vm1008_vm0, %v3622_v40  ;;  %v3715_v38 = vld [vmem:[%s3953_s11 + $0x350] ss:$8 sps:$4 sm:$0xff]   ;;  %v3716_v39 = vld [vmem:[%s3953_s11 + $0x164] ss:$8 sps:$4 sm:$0xff]  }
  0x61   : > { %v3718_v40 = vld [vmem:[%s3953_s11 + $0x364] ss:$8 sps:$4 sm:$0xff]  }
  0x67   : > { %1289 = vmatmul.mubr.bf16.gmra.mrb[24].mxu0 %v3624_v41  ;;  %1545 = vmatmul.mubr.bf16.gmra.mrb[24].mxu1 %v3625_v42  ;;  %v3720_v41 = vld [vmem:[%s3953_s11 + $0x160] ss:$8 sps:$4 sm:$0xff]  }
  0x68   : > { %2792 = vmatprep.mubr.msk.bf16.mxu0 %vm1008_vm0, %v3626_v43  ;;  %2824 = vmatprep.mubr.msk.bf16.mxu1 %vm1008_vm0, %v3628_v44  ;;  %v3721_v42 = vld [vmem:[%s3953_s11 + $0x360] ss:$8 sps:$4 sm:$0xff]   ;;  %v3722_v43 = vld [vmem:[%s3953_s11 + $0x174] ss:$8 sps:$4 sm:$0xff]  }
  0x69   : > { %v3724_v44 = vld [vmem:[%s3953_s11 + $0x374] ss:$8 sps:$4 sm:$0xff]  }
  0x6f   : > { %1297 = vmatmul.mubr.bf16.gmra.mrb[28].mxu0 %v3630_v45  ;;  %1553 = vmatmul.mubr.bf16.gmra.mrb[28].mxu1 %v3631_v46  ;;  %v3726_v45 = vld [vmem:[%s3953_s11 + $0x170] ss:$8 sps:$4 sm:$0xff]  }
  0x70   : > { %2793 = vmatprep.mubr.msk.bf16.mxu0 %vm1008_vm0, %v3632_v47  ;;  %2825 = vmatprep.mubr.msk.bf16.mxu1 %vm1008_vm0, %v3634_v48  ;;  %v3727_v46 = vld [vmem:[%s3953_s11 + $0x370] ss:$8 sps:$4 sm:$0xff]   ;;  %v3728_v47 = vld [vmem:[%s3953_s11 + $0x184] ss:$8 sps:$4 sm:$0xff]  }
  0x71   : > { %v3730_v48 = vld [vmem:[%s3953_s11 + $0x384] ss:$8 sps:$4 sm:$0xff]  }
  0x77   : > { %1305 = vmatmul.mubr.bf16.gmra.mrb[32].mxu0 %v3636_v49  ;;  %1561 = vmatmul.mubr.bf16.gmra.mrb[32].mxu1 %v3637_v50  ;;  %v3732_v49 = vld [vmem:[%s3953_s11 + $0x180] ss:$8 sps:$4 sm:$0xff]  }
  0x78   : > { %2794 = vmatprep.mubr.msk.bf16.mxu0 %vm1008_vm0, %v3638_v51  ;;  %2826 = vmatprep.mubr.msk.bf16.mxu1 %vm1008_vm0, %v3640_v52  ;;  %v3733_v50 = vld [vmem:[%s3953_s11 + $0x380] ss:$8 sps:$4 sm:$0xff]   ;;  %v3734_v51 = vld [vmem:[%s3953_s11 + $0x194] ss:$8 sps:$4 sm:$0xff]  }
  0x79   : > { %v3736_v52 = vld [vmem:[%s3953_s11 + $0x394] ss:$8 sps:$4 sm:$0xff]  }
  0x7f   : > { %1313 = vmatmul.mubr.bf16.gmra.mrb[36].mxu0 %v3642_v53  ;;  %1569 = vmatmul.mubr.bf16.gmra.mrb[36].mxu1 %v3643_v54  ;;  %v3738_v53 = vld [vmem:[%s3953_s11 + $0x190] ss:$8 sps:$4 sm:$0xff]  }
  0x80   : > { %2795 = vmatprep.mubr.msk.bf16.mxu0 %vm1008_vm0, %v3644_v55  ;;  %2827 = vmatprep.mubr.msk.bf16.mxu1 %vm1008_vm0, %v3646_v56  ;;  %v3739_v54 = vld [vmem:[%s3953_s11 + $0x390] ss:$8 sps:$4 sm:$0xff]   ;;  %v3740_v55 = vld [vmem:[%s3953_s11 + $0x1a4] ss:$8 sps:$4 sm:$0xff]  }
  0x81   : > { %v3742_v56 = vld [vmem:[%s3953_s11 + $0x3a4] ss:$8 sps:$4 sm:$0xff]  }
  0x87   : > { %1321 = vmatmul.mubr.bf16.gmra.mrb[40].mxu0 %v3648_v57  ;;  %1577 = vmatmul.mubr.bf16.gmra.mrb[40].mxu1 %v3649_v58  ;;  %v3744_v57 = vld [vmem:[%s3953_s11 + $0x1a0] ss:$8 sps:$4 sm:$0xff]  }
  0x88   : > { %2796 = vmatprep.mubr.msk.bf16.mxu0 %vm1008_vm0, %v3650_v59  ;;  %2828 = vmatprep.mubr.msk.bf16.mxu1 %vm1008_vm0, %v3652_v60  ;;  %v3745_v58 = vld [vmem:[%s3953_s11 + $0x3a0] ss:$8 sps:$4 sm:$0xff]   ;;  %v3746_v59 = vld [vmem:[%s3953_s11 + $0x1b4] ss:$8 sps:$4 sm:$0xff]  }
  0x89   : > { %v3748_v60 = vld [vmem:[%s3953_s11 + $0x3b4] ss:$8 sps:$4 sm:$0xff]  }
  0x8f   : > { %1329 = vmatmul.mubr.bf16.gmra.mrb[44].mxu0 %v3654_v61  ;;  %1585 = vmatmul.mubr.bf16.gmra.mrb[44].mxu1 %v3655_v62  ;;  %v4140_v61 = vld [vmem:[%s4431_s2] ss:$0 sm:$0xff] }
  0x90   : > { %2797 = vmatprep.mubr.msk.bf16.mxu0 %vm1008_vm0, %v3656_v63  ;;  %2829 = vmatprep.mubr.msk.bf16.mxu1 %vm1008_vm0, %v3658_v0 }
  0x97   : > { %1337 = vmatmul.mubr.bf16.gmra.mrb[48].mxu0 %v3660_v1  ;;  %1593 = vmatmul.mubr.bf16.gmra.mrb[48].mxu1 %v3661_v2 }
  0x98   : > { %2798 = vmatprep.mubr.msk.bf16.mxu0 %vm1008_vm0, %v3662_v3  ;;  %2830 = vmatprep.mubr.msk.bf16.mxu1 %vm1008_vm0, %v3664_v4  ;;  %v3750_v4 = vld [vmem:[%s3953_s11 + $0x1b0] ss:$8 sps:$4 sm:$0xff]  }
  0x9f   : > { %1345 = vmatmul.mubr.bf16.gmra.mrb[52].mxu0 %v3666_v5  ;;  %1601 = vmatmul.mubr.bf16.gmra.mrb[52].mxu1 %v3667_v6  ;;  %v3751_v5 = vld [vmem:[%s3953_s11 + $0x3b0] ss:$8 sps:$4 sm:$0xff]  }
  0xa0   : > { %2799 = vmatprep.mubr.msk.bf16.mxu0 %vm1008_vm0, %v3668_v7  ;;  %2831 = vmatprep.mubr.msk.bf16.mxu1 %vm1008_vm0, %v3670_v8  ;;  %v3752_v8 = vld [vmem:[%s3953_s11 + $0x1c4] ss:$8 sps:$4 sm:$0xff]  }
  0xa7   : > { %1353 = vmatmul.mubr.bf16.gmra.mrb[56].mxu0 %v3672_v9  ;;  %1609 = vmatmul.mubr.bf16.gmra.mrb[56].mxu1 %v3673_v10  ;;  %v3754_v9 = vld [vmem:[%s3953_s11 + $0x3c4] ss:$8 sps:$4 sm:$0xff]  }
  0xa8   : > { %2800 = vmatprep.mubr.msk.bf16.mxu0 %vm1008_vm0, %v3674_v11  ;;  %2832 = vmatprep.mubr.msk.bf16.mxu1 %vm1008_vm0, %v3676_v12 }
  0xaf   : > { %1361 = vmatmul.mubr.bf16.gmra.mrb[60].mxu0 %v3678_v13  ;;  %1617 = vmatmul.mubr.bf16.gmra.mrb[60].mxu1 %v3679_v14 }
  0xb0   : > { %2801 = vmatprep.mubr.msk.bf16.mxu0 %vm1008_vm0, %v3680_v15  ;;  %2833 = vmatprep.mubr.msk.bf16.mxu1 %vm1008_vm0, %v3682_v16 }
  0xb7   : > { %1369 = vmatmul.mubr.bf16.gmra.mrb[64].mxu0 %v3684_v17  ;;  %1625 = vmatmul.mubr.bf16.gmra.mrb[64].mxu1 %v3685_v18 }
  0xb8   : > { %2802 = vmatprep.mubr.msk.bf16.mxu0 %vm1008_vm0, %v3686_v19  ;;  %2834 = vmatprep.mubr.msk.bf16.mxu1 %vm1008_vm0, %v3688_v20 }
  0xbf   : > { %1377 = vmatmul.mubr.bf16.gmra.mrb[68].mxu0 %v3690_v21  ;;  %1633 = vmatmul.mubr.bf16.gmra.mrb[68].mxu1 %v3691_v22 }
  0xc0   : > { %2803 = vmatprep.mubr.msk.bf16.mxu0 %vm1008_vm0, %v3692_v23  ;;  %2835 = vmatprep.mubr.msk.bf16.mxu1 %vm1008_vm0, %v3694_v24 }
  0xc7   : > { %1385 = vmatmul.mubr.bf16.gmra.mrb[72].mxu0 %v3696_v25  ;;  %1641 = vmatmul.mubr.bf16.gmra.mrb[72].mxu1 %v3697_v26  ;;  %v3756_v26 = vld [vmem:[%s3953_s11 + $0x1c0] ss:$8 sps:$4 sm:$0xff]  }
  0xc8   : > { %2804 = vmatprep.mubr.msk.bf16.mxu0 %vm1008_vm0, %v3698_v27  ;;  %2836 = vmatprep.mubr.msk.bf16.mxu1 %vm1008_vm0, %v3700_v28  ;;  %v3757_v27 = vld [vmem:[%s3953_s11 + $0x3c0] ss:$8 sps:$4 sm:$0xff]  }
  0xcf   : > { %1393 = vmatmul.mubr.bf16.gmra.mrb[76].mxu0 %v3702_v29  ;;  %1649 = vmatmul.mubr.bf16.gmra.mrb[76].mxu1 %v3703_v30  ;;  %v3758_v30 = vld [vmem:[%s3953_s11 + $0x1d4] ss:$8 sps:$4 sm:$0xff]  }
  0xd0   : > { %2805 = vmatprep.mubr.msk.bf16.mxu0 %vm1008_vm0, %v3704_v31  ;;  %2837 = vmatprep.mubr.msk.bf16.mxu1 %vm1008_vm0, %v3706_v32  ;;  %v3760_v31 = vld [vmem:[%s3953_s11 + $0x3d4] ss:$8 sps:$4 sm:$0xff]  }
  0xd7   : > { %1401 = vmatmul.mubr.bf16.gmra.mrb[80].mxu0 %v3708_v33  ;;  %1657 = vmatmul.mubr.bf16.gmra.mrb[80].mxu1 %v3709_v34 }
  0xd8   : > { %2806 = vmatprep.mubr.msk.bf16.mxu0 %vm1008_vm0, %v3710_v35  ;;  %2838 = vmatprep.mubr.msk.bf16.mxu1 %vm1008_vm0, %v3712_v36 }
  0xdf   : > { %1409 = vmatmul.mubr.bf16.gmra.mrb[84].mxu0 %v3714_v37  ;;  %1665 = vmatmul.mubr.bf16.gmra.mrb[84].mxu1 %v3715_v38 }
  0xe0   : > { %2807 = vmatprep.mubr.msk.bf16.mxu0 %vm1008_vm0, %v3716_v39  ;;  %2839 = vmatprep.mubr.msk.bf16.mxu1 %vm1008_vm0, %v3718_v40 }
  0xe7   : > { %1417 = vmatmul.mubr.bf16.gmra.mrb[88].mxu0 %v3720_v41  ;;  %1673 = vmatmul.mubr.bf16.gmra.mrb[88].mxu1 %v3721_v42 }
  0xe8   : > { %2808 = vmatprep.mubr.msk.bf16.mxu0 %vm1008_vm0, %v3722_v43  ;;  %2840 = vmatprep.mubr.msk.bf16.mxu1 %vm1008_vm0, %v3724_v44 }
  0xef   : > { %1425 = vmatmul.mubr.bf16.gmra.mrb[92].mxu0 %v3726_v45  ;;  %1681 = vmatmul.mubr.bf16.gmra.mrb[92].mxu1 %v3727_v46 }
  0xf0   : > { %2809 = vmatprep.mubr.msk.bf16.mxu0 %vm1008_vm0, %v3728_v47  ;;  %2841 = vmatprep.mubr.msk.bf16.mxu1 %vm1008_vm0, %v3730_v48  ;;  %v3762_v48 = vld [vmem:[%s3953_s11 + $0x1d0] ss:$8 sps:$4 sm:$0xff]  }
  0xf7   : > { %1433 = vmatmul.mubr.bf16.gmra.mrb[96].mxu0 %v3732_v49  ;;  %1689 = vmatmul.mubr.bf16.gmra.mrb[96].mxu1 %v3733_v50  ;;  %v3763_v49 = vld [vmem:[%s3953_s11 + $0x3d0] ss:$8 sps:$4 sm:$0xff]  }
  0xf8   : > { %2810 = vmatprep.mubr.msk.bf16.mxu0 %vm1008_vm0, %v3734_v51  ;;  %2842 = vmatprep.mubr.msk.bf16.mxu1 %vm1008_vm0, %v3736_v52  ;;  %v3764_v52 = vld [vmem:[%s3953_s11 + $0x1e4] ss:$8 sps:$4 sm:$0xff]  }
  0xff   : > { %1441 = vmatmul.mubr.bf16.gmra.mrb[100].mxu0 %v3738_v53  ;;  %1697 = vmatmul.mubr.bf16.gmra.mrb[100].mxu1 %v3739_v54  ;;  %v3766_v53 = vld [vmem:[%s3953_s11 + $0x3e4] ss:$8 sps:$4 sm:$0xff]  }
 0x100   : > { %2811 = vmatprep.mubr.msk.bf16.mxu0 %vm1008_vm0, %v3740_v55  ;;  %2843 = vmatprep.mubr.msk.bf16.mxu1 %vm1008_vm0, %v3742_v56 }
 0x107   : > { %1449 = vmatmul.mubr.bf16.gmra.mrb[104].mxu0 %v3744_v57  ;;  %1705 = vmatmul.mubr.bf16.gmra.mrb[104].mxu1 %v3745_v58 }
 0x108   : > { %2812 = vmatprep.mubr.msk.bf16.mxu0 %vm1008_vm0, %v3746_v59  ;;  %2844 = vmatprep.mubr.msk.bf16.mxu1 %vm1008_vm0, %v3748_v60 }
 0x10a   : > { %v1242_v62 = vpop.f32.mrb[0].mxu0  ;;  %v1498_v63 = vpop.f32.mrb[0].mxu1 }
 0x10b   : > { %v1243_v0 = vadd.f32 %v4140_v61, %v1242_v62  ;;  %v1499_v1 = vadd.f32 %v4140_v61, %v1498_v63  ;;  %v1244_v2 = vpop.f32.mrb[1].mxu0  ;;  %v1500_v3 = vpop.f32.mrb[1].mxu1 }
 0x10c   : > { %v1245_v6 = vpop.f32.mrb[2].mxu0  ;;  %v1501_v7 = vpop.f32.mrb[2].mxu1 }
 0x10d   : > { %v1246_v10 = vadd.f32 %v4140_v61, %v1245_v6  ;;  %v1502_v11 = vadd.f32 %v4140_v61, %v1501_v7  ;;  %v1247_v12 = vpop.f32.mrb[3].mxu0  ;;  %v1503_v13 = vpop.f32.mrb[3].mxu1  ;;  %v1753_v14 = vmax.f32 %v1243_v0, 0.0  ;;  %v1817_v15 = vmax.f32 %v1499_v1, 0.0  ;;  %v3768_v7 = vld [vmem:[%s3953_s11 + $0x1e0] ss:$8 sps:$4 sm:$0xff]  }
 0x10e   : > { %v3772_v12 = vld [vmem:[%s3953_s11 + $0x3f4] ss:$8 sps:$4 sm:$0xff]  }
 0x10f   : > { %v1754_v16 = vmax.f32 %v1246_v10, 0.0  ;;  %v1818_v17 = vmax.f32 %v1502_v11, 0.0  ;;  %1457 = vmatmul.mubr.bf16.gmra.mrb[108].mxu0 %v3750_v4  ;;  %1713 = vmatmul.mubr.bf16.gmra.mrb[108].mxu1 %v3751_v5  ;;  %v3770_v11 = vld [vmem:[%s3953_s11 + $0x1f4] ss:$8 sps:$4 sm:$0xff]  }
 0x110   : > { %2813 = vmatprep.mubr.msk.bf16.mxu0 %vm1008_vm0, %v3752_v8  ;;  %2845 = vmatprep.mubr.msk.bf16.mxu1 %vm1008_vm0, %v3754_v9  ;;  %v3769_v8 = vld [vmem:[%s3953_s11 + $0x3e0] ss:$8 sps:$4 sm:$0xff]  }
 0x111   : > { %v3115_v18 = vpack.c.bf16 %v1754_v16, %v1753_v14  ;;  %v3275_v19 = vpack.c.bf16 %v1818_v17, %v1817_v15 }
 0x112   : > { %v1250_v20 = vpop.f32.mrb[4].mxu0  ;;  %v1506_v21 = vpop.f32.mrb[4].mxu1 }
 0x113   : > { %3116 = vst [vmem:[%s4157_s18] sm:$0xff] %v3115_v18   ;;  %3463 = vst [vmem:[%s4157_s18 + $0x100] sm:$0xff] %v3275_v19   ;;  %v1251_v22 = vadd.f32 %v4140_v61, %v1250_v20  ;;  %v1507_v23 = vadd.f32 %v4140_v61, %v1506_v21  ;;  %v1252_v24 = vpop.f32.mrb[5].mxu0  ;;  %v1508_v25 = vpop.f32.mrb[5].mxu1 }
 0x114   : > { %v1253_v28 = vpop.f32.mrb[6].mxu0  ;;  %v1509_v29 = vpop.f32.mrb[6].mxu1 }
 0x115   : > { %v1254_v32 = vadd.f32 %v4140_v61, %v1253_v28  ;;  %v1510_v33 = vadd.f32 %v4140_v61, %v1509_v29  ;;  %v1255_v34 = vpop.f32.mrb[7].mxu0  ;;  %v1511_v35 = vpop.f32.mrb[7].mxu1  ;;  %v1755_v36 = vmax.f32 %v1251_v22, 0.0  ;;  %v1819_v37 = vmax.f32 %v1507_v23, 0.0  ;;  %v3774_v29 = vld [vmem:[%s3953_s11 + $0x1f0] ss:$8 sps:$4 sm:$0xff]  }
 0x117   : > { %v1756_v38 = vmax.f32 %v1254_v32, 0.0  ;;  %v1820_v39 = vmax.f32 %v1510_v33, 0.0  ;;  %1465 = vmatmul.mubr.bf16.gmra.mrb[112].mxu0 %v3756_v26  ;;  %1721 = vmatmul.mubr.bf16.gmra.mrb[112].mxu1 %v3757_v27 }
 0x118   : > { %2814 = vmatprep.mubr.msk.bf16.mxu0 %vm1008_vm0, %v3758_v30  ;;  %2846 = vmatprep.mubr.msk.bf16.mxu1 %vm1008_vm0, %v3760_v31  ;;  %v3775_v30 = vld [vmem:[%s3953_s11 + $0x3f0] ss:$8 sps:$4 sm:$0xff]  }
 0x119   : > { %v3120_v40 = vpack.c.bf16 %v1756_v38, %v1755_v36  ;;  %v3280_v41 = vpack.c.bf16 %v1820_v39, %v1819_v37 }
 0x11a   : > { %v1258_v42 = vpop.f32.mrb[8].mxu0  ;;  %v1514_v43 = vpop.f32.mrb[8].mxu1 }
 0x11b   : > { %3432 = vst [vmem:[%s4157_s18 + $0x8] sm:$0xff] %v3120_v40   ;;  %3464 = vst [vmem:[%s4157_s18 + $0x108] sm:$0xff] %v3280_v41   ;;  %v1259_v44 = vadd.f32 %v4140_v61, %v1258_v42  ;;  %v1515_v45 = vadd.f32 %v4140_v61, %v1514_v43  ;;  %v1260_v46 = vpop.f32.mrb[9].mxu0  ;;  %v1516_v47 = vpop.f32.mrb[9].mxu1 }
 0x11c   : > { %v1261_v50 = vpop.f32.mrb[10].mxu0  ;;  %v1517_v51 = vpop.f32.mrb[10].mxu1 }
 0x11d   : > { %v1262_v54 = vadd.f32 %v4140_v61, %v1261_v50  ;;  %v1518_v55 = vadd.f32 %v4140_v61, %v1517_v51  ;;  %v1263_v56 = vpop.f32.mrb[11].mxu0  ;;  %v1519_v57 = vpop.f32.mrb[11].mxu1  ;;  %v1757_v58 = vmax.f32 %v1259_v44, 0.0  ;;  %v1821_v59 = vmax.f32 %v1515_v45, 0.0 }
 0x11f   : > { %v1758_v60 = vmax.f32 %v1262_v54, 0.0  ;;  %v1822_v62 = vmax.f32 %v1518_v55, 0.0  ;;  %1473 = vmatmul.mubr.bf16.gmra.mrb[116].mxu0 %v3762_v48  ;;  %1729 = vmatmul.mubr.bf16.gmra.mrb[116].mxu1 %v3763_v49 }
 0x120   : > { %2815 = vmatprep.mubr.msk.bf16.mxu0 %vm1008_vm0, %v3764_v52  ;;  %2847 = vmatprep.mubr.msk.bf16.mxu1 %vm1008_vm0, %v3766_v53 }
 0x121   : > { %v3125_v63 = vpack.c.bf16 %v1758_v60, %v1757_v58  ;;  %v3285_v0 = vpack.c.bf16 %v1822_v62, %v1821_v59 }
 0x122   : > { %v1266_v1 = vpop.f32.mrb[12].mxu0  ;;  %v1522_v2 = vpop.f32.mrb[12].mxu1 }
 0x123   : > { %3433 = vst [vmem:[%s4157_s18 + $0x10] sm:$0xff] %v3125_v63   ;;  %3465 = vst [vmem:[%s4157_s18 + $0x110] sm:$0xff] %v3285_v0   ;;  %v1267_v3 = vadd.f32 %v4140_v61, %v1266_v1  ;;  %v1523_v4 = vadd.f32 %v4140_v61, %v1522_v2  ;;  %v1268_v5 = vpop.f32.mrb[13].mxu0  ;;  %v1524_v6 = vpop.f32.mrb[13].mxu1 }
 0x124   : > { %v1269_v9 = vpop.f32.mrb[14].mxu0  ;;  %v1525_v10 = vpop.f32.mrb[14].mxu1 }
 0x125   : > { %v1270_v13 = vadd.f32 %v4140_v61, %v1269_v9  ;;  %v1526_v14 = vadd.f32 %v4140_v61, %v1525_v10  ;;  %v1271_v15 = vpop.f32.mrb[15].mxu0  ;;  %v1527_v16 = vpop.f32.mrb[15].mxu1  ;;  %v1759_v17 = vmax.f32 %v1267_v3, 0.0  ;;  %v1823_v18 = vmax.f32 %v1523_v4, 0.0 }
 0x127   : > { %v1760_v19 = vmax.f32 %v1270_v13, 0.0  ;;  %v1824_v20 = vmax.f32 %v1526_v14, 0.0  ;;  %1481 = vmatmul.mubr.bf16.gmra.mrb[120].mxu0 %v3768_v7  ;;  %1737 = vmatmul.mubr.bf16.gmra.mrb[120].mxu1 %v3769_v8 }
 0x128   : > { %2816 = vmatprep.mubr.msk.bf16.mxu0 %vm1008_vm0, %v3770_v11  ;;  %2848 = vmatprep.mubr.msk.bf16.mxu1 %vm1008_vm0, %v3772_v12 }
 0x129   : > { %v3130_v21 = vpack.c.bf16 %v1760_v19, %v1759_v17  ;;  %v3290_v22 = vpack.c.bf16 %v1824_v20, %v1823_v18 }
 0x12a   : > { %v1274_v23 = vpop.f32.mrb[16].mxu0  ;;  %v1530_v24 = vpop.f32.mrb[16].mxu1 }
 0x12b   : > { %3434 = vst [vmem:[%s4157_s18 + $0x18] sm:$0xff] %v3130_v21   ;;  %3466 = vst [vmem:[%s4157_s18 + $0x118] sm:$0xff] %v3290_v22   ;;  %v1275_v25 = vadd.f32 %v4140_v61, %v1274_v23  ;;  %v1531_v26 = vadd.f32 %v4140_v61, %v1530_v24  ;;  %v1276_v27 = vpop.f32.mrb[17].mxu0  ;;  %v1532_v28 = vpop.f32.mrb[17].mxu1 }
 0x12c   : > { %v1277_v31 = vpop.f32.mrb[18].mxu0  ;;  %v1533_v32 = vpop.f32.mrb[18].mxu1 }
 0x12d   : > { %v1278_v33 = vadd.f32 %v4140_v61, %v1277_v31  ;;  %v1534_v34 = vadd.f32 %v4140_v61, %v1533_v32  ;;  %v1279_v35 = vpop.f32.mrb[19].mxu0  ;;  %v1535_v36 = vpop.f32.mrb[19].mxu1  ;;  %v1761_v37 = vmax.f32 %v1275_v25, 0.0  ;;  %v1825_v38 = vmax.f32 %v1531_v26, 0.0 }
 0x12f   : > { %v1762_v39 = vmax.f32 %v1278_v33, 0.0  ;;  %v1826_v40 = vmax.f32 %v1534_v34, 0.0  ;;  %1489 = vmatmul.mubr.bf16.gmra.mrb[124].mxu0 %v3774_v29  ;;  %1745 = vmatmul.mubr.bf16.gmra.mrb[124].mxu1 %v3775_v30 }
 0x131   : > { %v3135_v41 = vpack.c.bf16 %v1762_v39, %v1761_v37  ;;  %v3295_v42 = vpack.c.bf16 %v1826_v40, %v1825_v38 }
 0x132   : > { %v1282_v43 = vpop.f32.mrb[20].mxu0  ;;  %v1538_v44 = vpop.f32.mrb[20].mxu1 }
 0x133   : > { %3435 = vst [vmem:[%s4157_s18 + $0x20] sm:$0xff] %v3135_v41   ;;  %3467 = vst [vmem:[%s4157_s18 + $0x120] sm:$0xff] %v3295_v42   ;;  %v1283_v45 = vadd.f32 %v4140_v61, %v1282_v43  ;;  %v1539_v46 = vadd.f32 %v4140_v61, %v1538_v44  ;;  %v1284_v47 = vpop.f32.mrb[21].mxu0  ;;  %v1540_v48 = vpop.f32.mrb[21].mxu1 }
 0x134   : > { %v1285_v49 = vpop.f32.mrb[22].mxu0  ;;  %v1541_v50 = vpop.f32.mrb[22].mxu1 }
 0x135   : > { %v1286_v51 = vadd.f32 %v4140_v61, %v1285_v49  ;;  %v1542_v52 = vadd.f32 %v4140_v61, %v1541_v50  ;;  %v1287_v53 = vpop.f32.mrb[23].mxu0  ;;  %v1543_v54 = vpop.f32.mrb[23].mxu1  ;;  %v1763_v55 = vmax.f32 %v1283_v45, 0.0  ;;  %v1827_v56 = vmax.f32 %v1539_v46, 0.0 }
 0x137   : > { %v1764_v57 = vmax.f32 %v1286_v51, 0.0  ;;  %v1828_v58 = vmax.f32 %v1542_v52, 0.0 }
 0x139   : > { %v3140_v59 = vpack.c.bf16 %v1764_v57, %v1763_v55  ;;  %v3300_v60 = vpack.c.bf16 %v1828_v58, %v1827_v56 }
 0x13a   : > { %v1290_v62 = vpop.f32.mrb[24].mxu0  ;;  %v1546_v63 = vpop.f32.mrb[24].mxu1 }
 0x13b   : > { %3436 = vst [vmem:[%s4157_s18 + $0x28] sm:$0xff] %v3140_v59   ;;  %3468 = vst [vmem:[%s4157_s18 + $0x128] sm:$0xff] %v3300_v60   ;;  %v1291_v0 = vadd.f32 %v4140_v61, %v1290_v62  ;;  %v1547_v1 = vadd.f32 %v4140_v61, %v1546_v63  ;;  %v1292_v2 = vpop.f32.mrb[25].mxu0  ;;  %v1548_v3 = vpop.f32.mrb[25].mxu1 }
 0x13c   : > { %v1293_v4 = vpop.f32.mrb[26].mxu0  ;;  %v1549_v5 = vpop.f32.mrb[26].mxu1 }
 0x13d   : > { %v1294_v6 = vadd.f32 %v4140_v61, %v1293_v4  ;;  %v1550_v7 = vadd.f32 %v4140_v61, %v1549_v5  ;;  %v1295_v8 = vpop.f32.mrb[27].mxu0  ;;  %v1551_v9 = vpop.f32.mrb[27].mxu1  ;;  %v1765_v10 = vmax.f32 %v1291_v0, 0.0  ;;  %v1829_v11 = vmax.f32 %v1547_v1, 0.0 }
 0x13f   : > { %v1766_v12 = vmax.f32 %v1294_v6, 0.0  ;;  %v1830_v13 = vmax.f32 %v1550_v7, 0.0 }
 0x141   : > { %v3145_v14 = vpack.c.bf16 %v1766_v12, %v1765_v10  ;;  %v3305_v15 = vpack.c.bf16 %v1830_v13, %v1829_v11 }
 0x142   : > { %v1298_v16 = vpop.f32.mrb[28].mxu0  ;;  %v1554_v17 = vpop.f32.mrb[28].mxu1 }
 0x143   : > { %3437 = vst [vmem:[%s4157_s18 + $0x30] sm:$0xff] %v3145_v14   ;;  %3469 = vst [vmem:[%s4157_s18 + $0x130] sm:$0xff] %v3305_v15   ;;  %v1299_v18 = vadd.f32 %v4140_v61, %v1298_v16  ;;  %v1555_v19 = vadd.f32 %v4140_v61, %v1554_v17  ;;  %v1300_v20 = vpop.f32.mrb[29].mxu0  ;;  %v1556_v21 = vpop.f32.mrb[29].mxu1 }
 0x144   : > { %v1301_v22 = vpop.f32.mrb[30].mxu0  ;;  %v1557_v23 = vpop.f32.mrb[30].mxu1 }
 0x145   : > { %v1302_v24 = vadd.f32 %v4140_v61, %v1301_v22  ;;  %v1558_v25 = vadd.f32 %v4140_v61, %v1557_v23  ;;  %v1303_v26 = vpop.f32.mrb[31].mxu0  ;;  %v1559_v27 = vpop.f32.mrb[31].mxu1  ;;  %v1767_v28 = vmax.f32 %v1299_v18, 0.0  ;;  %v1831_v29 = vmax.f32 %v1555_v19, 0.0 }
 0x147   : > { %v1768_v30 = vmax.f32 %v1302_v24, 0.0  ;;  %v1832_v31 = vmax.f32 %v1558_v25, 0.0 }
 0x149   : > { %v3150_v32 = vpack.c.bf16 %v1768_v30, %v1767_v28  ;;  %v3310_v33 = vpack.c.bf16 %v1832_v31, %v1831_v29 }
 0x14a   : > { %v1306_v34 = vpop.f32.mrb[32].mxu0  ;;  %v1562_v35 = vpop.f32.mrb[32].mxu1 }
 0x14b   : > { %3438 = vst [vmem:[%s4157_s18 + $0x38] sm:$0xff] %v3150_v32   ;;  %3470 = vst [vmem:[%s4157_s18 + $0x138] sm:$0xff] %v3310_v33   ;;  %v1307_v36 = vadd.f32 %v4140_v61, %v1306_v34  ;;  %v1563_v37 = vadd.f32 %v4140_v61, %v1562_v35  ;;  %v1308_v38 = vpop.f32.mrb[33].mxu0  ;;  %v1564_v39 = vpop.f32.mrb[33].mxu1 }
 0x14c   : > { %v1309_v40 = vpop.f32.mrb[34].mxu0  ;;  %v1565_v41 = vpop.f32.mrb[34].mxu1 }
 0x14d   : > { %v1310_v42 = vadd.f32 %v4140_v61, %v1309_v40  ;;  %v1566_v43 = vadd.f32 %v4140_v61, %v1565_v41  ;;  %v1311_v44 = vpop.f32.mrb[35].mxu0  ;;  %v1567_v45 = vpop.f32.mrb[35].mxu1  ;;  %v1769_v46 = vmax.f32 %v1307_v36, 0.0  ;;  %v1833_v47 = vmax.f32 %v1563_v37, 0.0 }
 0x14f   : > { %v1770_v48 = vmax.f32 %v1310_v42, 0.0  ;;  %v1834_v49 = vmax.f32 %v1566_v43, 0.0 }
 0x151   : > { %v3155_v50 = vpack.c.bf16 %v1770_v48, %v1769_v46  ;;  %v3315_v51 = vpack.c.bf16 %v1834_v49, %v1833_v47 }
 0x152   : > { %v1314_v52 = vpop.f32.mrb[36].mxu0  ;;  %v1570_v53 = vpop.f32.mrb[36].mxu1 }
 0x153   : > { %3439 = vst [vmem:[%s4157_s18 + $0x40] sm:$0xff] %v3155_v50   ;;  %3471 = vst [vmem:[%s4157_s18 + $0x140] sm:$0xff] %v3315_v51   ;;  %v1315_v54 = vadd.f32 %v4140_v61, %v1314_v52  ;;  %v1571_v55 = vadd.f32 %v4140_v61, %v1570_v53  ;;  %v1316_v56 = vpop.f32.mrb[37].mxu0  ;;  %v1572_v57 = vpop.f32.mrb[37].mxu1 }
 0x154   : > { %v1317_v58 = vpop.f32.mrb[38].mxu0  ;;  %v1573_v59 = vpop.f32.mrb[38].mxu1 }
 0x155   : > { %v1318_v60 = vadd.f32 %v4140_v61, %v1317_v58  ;;  %v1574_v62 = vadd.f32 %v4140_v61, %v1573_v59  ;;  %v1319_v63 = vpop.f32.mrb[39].mxu0  ;;  %v1575_v0 = vpop.f32.mrb[39].mxu1  ;;  %v1771_v1 = vmax.f32 %v1315_v54, 0.0  ;;  %v1835_v2 = vmax.f32 %v1571_v55, 0.0 }
 0x157   : > { %v1772_v3 = vmax.f32 %v1318_v60, 0.0  ;;  %v1836_v4 = vmax.f32 %v1574_v62, 0.0 }
 0x159   : > { %v3160_v5 = vpack.c.bf16 %v1772_v3, %v1771_v1  ;;  %v3320_v6 = vpack.c.bf16 %v1836_v4, %v1835_v2 }
 0x15a   : > { %v1322_v7 = vpop.f32.mrb[40].mxu0  ;;  %v1578_v8 = vpop.f32.mrb[40].mxu1 }
 0x15b   : > { %3440 = vst [vmem:[%s4157_s18 + $0x48] sm:$0xff] %v3160_v5   ;;  %3472 = vst [vmem:[%s4157_s18 + $0x148] sm:$0xff] %v3320_v6   ;;  %v1323_v9 = vadd.f32 %v4140_v61, %v1322_v7  ;;  %v1579_v10 = vadd.f32 %v4140_v61, %v1578_v8  ;;  %v1324_v11 = vpop.f32.mrb[41].mxu0  ;;  %v1580_v12 = vpop.f32.mrb[41].mxu1 }
 0x15c   : > { %v1325_v13 = vpop.f32.mrb[42].mxu0  ;;  %v1581_v14 = vpop.f32.mrb[42].mxu1 }
 0x15d   : > { %v1326_v15 = vadd.f32 %v4140_v61, %v1325_v13  ;;  %v1582_v16 = vadd.f32 %v4140_v61, %v1581_v14  ;;  %v1327_v17 = vpop.f32.mrb[43].mxu0  ;;  %v1583_v18 = vpop.f32.mrb[43].mxu1  ;;  %v1773_v19 = vmax.f32 %v1323_v9, 0.0  ;;  %v1837_v20 = vmax.f32 %v1579_v10, 0.0 }
 0x15f   : > { %v1774_v21 = vmax.f32 %v1326_v15, 0.0  ;;  %v1838_v22 = vmax.f32 %v1582_v16, 0.0 }
 0x161   : > { %v3165_v23 = vpack.c.bf16 %v1774_v21, %v1773_v19  ;;  %v3325_v24 = vpack.c.bf16 %v1838_v22, %v1837_v20 }
 0x162   : > { %v1330_v25 = vpop.f32.mrb[44].mxu0  ;;  %v1586_v26 = vpop.f32.mrb[44].mxu1 }
 0x163   : > { %3441 = vst [vmem:[%s4157_s18 + $0x50] sm:$0xff] %v3165_v23   ;;  %3473 = vst [vmem:[%s4157_s18 + $0x150] sm:$0xff] %v3325_v24   ;;  %v1331_v27 = vadd.f32 %v4140_v61, %v1330_v25  ;;  %v1587_v28 = vadd.f32 %v4140_v61, %v1586_v26  ;;  %v1332_v29 = vpop.f32.mrb[45].mxu0  ;;  %v1588_v30 = vpop.f32.mrb[45].mxu1 }
 0x164   : > { %v1333_v31 = vpop.f32.mrb[46].mxu0  ;;  %v1589_v32 = vpop.f32.mrb[46].mxu1 }
 0x165   : > { %v1334_v33 = vadd.f32 %v4140_v61, %v1333_v31  ;;  %v1590_v34 = vadd.f32 %v4140_v61, %v1589_v32  ;;  %v1335_v35 = vpop.f32.mrb[47].mxu0  ;;  %v1591_v36 = vpop.f32.mrb[47].mxu1  ;;  %v1775_v37 = vmax.f32 %v1331_v27, 0.0  ;;  %v1839_v38 = vmax.f32 %v1587_v28, 0.0 }
 0x167   : > { %v1776_v39 = vmax.f32 %v1334_v33, 0.0  ;;  %v1840_v40 = vmax.f32 %v1590_v34, 0.0 }
 0x169   : > { %v3170_v41 = vpack.c.bf16 %v1776_v39, %v1775_v37  ;;  %v3330_v42 = vpack.c.bf16 %v1840_v40, %v1839_v38 }
 0x16a   : > { %v1338_v43 = vpop.f32.mrb[48].mxu0  ;;  %v1594_v44 = vpop.f32.mrb[48].mxu1 }
 0x16b   : > { %3442 = vst [vmem:[%s4157_s18 + $0x58] sm:$0xff] %v3170_v41   ;;  %3474 = vst [vmem:[%s4157_s18 + $0x158] sm:$0xff] %v3330_v42   ;;  %v1339_v45 = vadd.f32 %v4140_v61, %v1338_v43  ;;  %v1595_v46 = vadd.f32 %v4140_v61, %v1594_v44  ;;  %v1340_v47 = vpop.f32.mrb[49].mxu0  ;;  %v1596_v48 = vpop.f32.mrb[49].mxu1 }
 0x16c   : > { %v1341_v49 = vpop.f32.mrb[50].mxu0  ;;  %v1597_v50 = vpop.f32.mrb[50].mxu1 }
 0x16d   : > { %v1342_v51 = vadd.f32 %v4140_v61, %v1341_v49  ;;  %v1598_v52 = vadd.f32 %v4140_v61, %v1597_v50  ;;  %v1343_v53 = vpop.f32.mrb[51].mxu0  ;;  %v1599_v54 = vpop.f32.mrb[51].mxu1  ;;  %v1777_v55 = vmax.f32 %v1339_v45, 0.0  ;;  %v1841_v56 = vmax.f32 %v1595_v46, 0.0 }
 0x16f   : > { %v1778_v57 = vmax.f32 %v1342_v51, 0.0  ;;  %v1842_v58 = vmax.f32 %v1598_v52, 0.0 }
 0x171   : > { %v3175_v59 = vpack.c.bf16 %v1778_v57, %v1777_v55  ;;  %v3335_v60 = vpack.c.bf16 %v1842_v58, %v1841_v56 }
 0x172   : > { %v1346_v62 = vpop.f32.mrb[52].mxu0  ;;  %v1602_v63 = vpop.f32.mrb[52].mxu1 }
 0x173   : > { %3443 = vst [vmem:[%s4157_s18 + $0x60] sm:$0xff] %v3175_v59   ;;  %3475 = vst [vmem:[%s4157_s18 + $0x160] sm:$0xff] %v3335_v60   ;;  %v1347_v0 = vadd.f32 %v4140_v61, %v1346_v62  ;;  %v1603_v1 = vadd.f32 %v4140_v61, %v1602_v63  ;;  %v1348_v2 = vpop.f32.mrb[53].mxu0  ;;  %v1604_v3 = vpop.f32.mrb[53].mxu1 }
 0x174   : > { %v1349_v4 = vpop.f32.mrb[54].mxu0  ;;  %v1605_v5 = vpop.f32.mrb[54].mxu1 }
 0x175   : > { %v1350_v6 = vadd.f32 %v4140_v61, %v1349_v4  ;;  %v1606_v7 = vadd.f32 %v4140_v61, %v1605_v5  ;;  %v1351_v8 = vpop.f32.mrb[55].mxu0  ;;  %v1607_v9 = vpop.f32.mrb[55].mxu1  ;;  %v1779_v10 = vmax.f32 %v1347_v0, 0.0  ;;  %v1843_v11 = vmax.f32 %v1603_v1, 0.0 }
 0x177   : > { %v1780_v12 = vmax.f32 %v1350_v6, 0.0  ;;  %v1844_v13 = vmax.f32 %v1606_v7, 0.0 }
 0x179   : > { %v3180_v14 = vpack.c.bf16 %v1780_v12, %v1779_v10  ;;  %v3340_v15 = vpack.c.bf16 %v1844_v13, %v1843_v11 }
 0x17a   : > { %v1354_v16 = vpop.f32.mrb[56].mxu0  ;;  %v1610_v17 = vpop.f32.mrb[56].mxu1 }
 0x17b   : > { %3444 = vst [vmem:[%s4157_s18 + $0x68] sm:$0xff] %v3180_v14   ;;  %3476 = vst [vmem:[%s4157_s18 + $0x168] sm:$0xff] %v3340_v15   ;;  %v1355_v18 = vadd.f32 %v4140_v61, %v1354_v16  ;;  %v1611_v19 = vadd.f32 %v4140_v61, %v1610_v17  ;;  %v1356_v20 = vpop.f32.mrb[57].mxu0  ;;  %v1612_v21 = vpop.f32.mrb[57].mxu1 }
 0x17c   : > { %v1357_v22 = vpop.f32.mrb[58].mxu0  ;;  %v1613_v23 = vpop.f32.mrb[58].mxu1 }
 0x17d   : > { %v1358_v24 = vadd.f32 %v4140_v61, %v1357_v22  ;;  %v1614_v25 = vadd.f32 %v4140_v61, %v1613_v23  ;;  %v1359_v26 = vpop.f32.mrb[59].mxu0  ;;  %v1615_v27 = vpop.f32.mrb[59].mxu1  ;;  %v1781_v28 = vmax.f32 %v1355_v18, 0.0  ;;  %v1845_v29 = vmax.f32 %v1611_v19, 0.0 }
 0x17f   : > { %v1782_v30 = vmax.f32 %v1358_v24, 0.0  ;;  %v1846_v31 = vmax.f32 %v1614_v25, 0.0 }
 0x181   : > { %v3185_v32 = vpack.c.bf16 %v1782_v30, %v1781_v28  ;;  %v3345_v33 = vpack.c.bf16 %v1846_v31, %v1845_v29 }
 0x182   : > { %v1362_v34 = vpop.f32.mrb[60].mxu0  ;;  %v1618_v35 = vpop.f32.mrb[60].mxu1 }
 0x183   : > { %3445 = vst [vmem:[%s4157_s18 + $0x70] sm:$0xff] %v3185_v32   ;;  %3477 = vst [vmem:[%s4157_s18 + $0x170] sm:$0xff] %v3345_v33   ;;  %v1363_v36 = vadd.f32 %v4140_v61, %v1362_v34  ;;  %v1619_v37 = vadd.f32 %v4140_v61, %v1618_v35  ;;  %v1364_v38 = vpop.f32.mrb[61].mxu0  ;;  %v1620_v39 = vpop.f32.mrb[61].mxu1 }
 0x184   : > { %v1365_v40 = vpop.f32.mrb[62].mxu0  ;;  %v1621_v41 = vpop.f32.mrb[62].mxu1 }
 0x185   : > { %v1366_v42 = vadd.f32 %v4140_v61, %v1365_v40  ;;  %v1622_v43 = vadd.f32 %v4140_v61, %v1621_v41  ;;  %v1367_v44 = vpop.f32.mrb[63].mxu0  ;;  %v1623_v45 = vpop.f32.mrb[63].mxu1  ;;  %v1783_v46 = vmax.f32 %v1363_v36, 0.0  ;;  %v1847_v47 = vmax.f32 %v1619_v37, 0.0 }
 0x187   : > { %v1784_v48 = vmax.f32 %v1366_v42, 0.0  ;;  %v1848_v49 = vmax.f32 %v1622_v43, 0.0 }
 0x189   : > { %v3190_v50 = vpack.c.bf16 %v1784_v48, %v1783_v46  ;;  %v3350_v51 = vpack.c.bf16 %v1848_v49, %v1847_v47 }
 0x18a   : > { %v1370_v52 = vpop.f32.mrb[64].mxu0  ;;  %v1626_v53 = vpop.f32.mrb[64].mxu1 }
 0x18b   : > { %3446 = vst [vmem:[%s4157_s18 + $0x78] sm:$0xff] %v3190_v50   ;;  %3478 = vst [vmem:[%s4157_s18 + $0x178] sm:$0xff] %v3350_v51   ;;  %v1371_v54 = vadd.f32 %v4140_v61, %v1370_v52  ;;  %v1627_v55 = vadd.f32 %v4140_v61, %v1626_v53  ;;  %v1372_v56 = vpop.f32.mrb[65].mxu0  ;;  %v1628_v57 = vpop.f32.mrb[65].mxu1 }
 0x18c   : > { %v1373_v58 = vpop.f32.mrb[66].mxu0  ;;  %v1629_v59 = vpop.f32.mrb[66].mxu1 }
 0x18d   : > { %v1374_v60 = vadd.f32 %v4140_v61, %v1373_v58  ;;  %v1630_v62 = vadd.f32 %v4140_v61, %v1629_v59  ;;  %v1375_v63 = vpop.f32.mrb[67].mxu0  ;;  %v1631_v0 = vpop.f32.mrb[67].mxu1  ;;  %v1785_v1 = vmax.f32 %v1371_v54, 0.0  ;;  %v1849_v2 = vmax.f32 %v1627_v55, 0.0 }
 0x18f   : > { %v1786_v3 = vmax.f32 %v1374_v60, 0.0  ;;  %v1850_v4 = vmax.f32 %v1630_v62, 0.0 }
 0x191   : > { %v3195_v5 = vpack.c.bf16 %v1786_v3, %v1785_v1  ;;  %v3355_v6 = vpack.c.bf16 %v1850_v4, %v1849_v2 }
 0x192   : > { %v1378_v7 = vpop.f32.mrb[68].mxu0  ;;  %v1634_v8 = vpop.f32.mrb[68].mxu1 }
 0x193   : > { %3447 = vst [vmem:[%s4157_s18 + $0x80] sm:$0xff] %v3195_v5   ;;  %3479 = vst [vmem:[%s4157_s18 + $0x180] sm:$0xff] %v3355_v6   ;;  %v1379_v9 = vadd.f32 %v4140_v61, %v1378_v7  ;;  %v1635_v10 = vadd.f32 %v4140_v61, %v1634_v8  ;;  %v1380_v11 = vpop.f32.mrb[69].mxu0  ;;  %v1636_v12 = vpop.f32.mrb[69].mxu1 }
 0x194   : > { %v1381_v13 = vpop.f32.mrb[70].mxu0  ;;  %v1637_v14 = vpop.f32.mrb[70].mxu1 }
 0x195   : > { %v1382_v15 = vadd.f32 %v4140_v61, %v1381_v13  ;;  %v1638_v16 = vadd.f32 %v4140_v61, %v1637_v14  ;;  %v1383_v17 = vpop.f32.mrb[71].mxu0  ;;  %v1639_v18 = vpop.f32.mrb[71].mxu1  ;;  %v1787_v19 = vmax.f32 %v1379_v9, 0.0  ;;  %v1851_v20 = vmax.f32 %v1635_v10, 0.0 }
 0x197   : > { %v1788_v21 = vmax.f32 %v1382_v15, 0.0  ;;  %v1852_v22 = vmax.f32 %v1638_v16, 0.0 }
 0x199   : > { %v3200_v23 = vpack.c.bf16 %v1788_v21, %v1787_v19  ;;  %v3360_v24 = vpack.c.bf16 %v1852_v22, %v1851_v20 }
 0x19a   : > { %v1386_v25 = vpop.f32.mrb[72].mxu0  ;;  %v1642_v26 = vpop.f32.mrb[72].mxu1 }
 0x19b   : > { %3448 = vst [vmem:[%s4157_s18 + $0x88] sm:$0xff] %v3200_v23   ;;  %3480 = vst [vmem:[%s4157_s18 + $0x188] sm:$0xff] %v3360_v24   ;;  %v1387_v27 = vadd.f32 %v4140_v61, %v1386_v25  ;;  %v1643_v28 = vadd.f32 %v4140_v61, %v1642_v26  ;;  %v1388_v29 = vpop.f32.mrb[73].mxu0  ;;  %v1644_v30 = vpop.f32.mrb[73].mxu1 }
 0x19c   : > { %v1389_v31 = vpop.f32.mrb[74].mxu0  ;;  %v1645_v32 = vpop.f32.mrb[74].mxu1 }
 0x19d   : > { %v1390_v33 = vadd.f32 %v4140_v61, %v1389_v31  ;;  %v1646_v34 = vadd.f32 %v4140_v61, %v1645_v32  ;;  %v1391_v35 = vpop.f32.mrb[75].mxu0  ;;  %v1647_v36 = vpop.f32.mrb[75].mxu1  ;;  %v1789_v37 = vmax.f32 %v1387_v27, 0.0  ;;  %v1853_v38 = vmax.f32 %v1643_v28, 0.0 }
 0x19f   : > { %v1790_v39 = vmax.f32 %v1390_v33, 0.0  ;;  %v1854_v40 = vmax.f32 %v1646_v34, 0.0 }
 0x1a1   : > { %v3205_v41 = vpack.c.bf16 %v1790_v39, %v1789_v37  ;;  %v3365_v42 = vpack.c.bf16 %v1854_v40, %v1853_v38 }
 0x1a2   : > { %v1394_v43 = vpop.f32.mrb[76].mxu0  ;;  %v1650_v44 = vpop.f32.mrb[76].mxu1 }
 0x1a3   : > { %3449 = vst [vmem:[%s4157_s18 + $0x90] sm:$0xff] %v3205_v41   ;;  %3481 = vst [vmem:[%s4157_s18 + $0x190] sm:$0xff] %v3365_v42   ;;  %v1395_v45 = vadd.f32 %v4140_v61, %v1394_v43  ;;  %v1651_v46 = vadd.f32 %v4140_v61, %v1650_v44  ;;  %v1396_v47 = vpop.f32.mrb[77].mxu0  ;;  %v1652_v48 = vpop.f32.mrb[77].mxu1 }
 0x1a4   : > { %v1397_v49 = vpop.f32.mrb[78].mxu0  ;;  %v1653_v50 = vpop.f32.mrb[78].mxu1 }
 0x1a5   : > { %v1398_v51 = vadd.f32 %v4140_v61, %v1397_v49  ;;  %v1654_v52 = vadd.f32 %v4140_v61, %v1653_v50  ;;  %v1399_v53 = vpop.f32.mrb[79].mxu0  ;;  %v1655_v54 = vpop.f32.mrb[79].mxu1  ;;  %v1791_v55 = vmax.f32 %v1395_v45, 0.0  ;;  %v1855_v56 = vmax.f32 %v1651_v46, 0.0 }
 0x1a7   : > { %v1792_v57 = vmax.f32 %v1398_v51, 0.0  ;;  %v1856_v58 = vmax.f32 %v1654_v52, 0.0 }
 0x1a9   : > { %v3210_v59 = vpack.c.bf16 %v1792_v57, %v1791_v55  ;;  %v3370_v60 = vpack.c.bf16 %v1856_v58, %v1855_v56 }
 0x1aa   : > { %v1402_v62 = vpop.f32.mrb[80].mxu0  ;;  %v1658_v63 = vpop.f32.mrb[80].mxu1 }
 0x1ab   : > { %3450 = vst [vmem:[%s4157_s18 + $0x98] sm:$0xff] %v3210_v59   ;;  %3482 = vst [vmem:[%s4157_s18 + $0x198] sm:$0xff] %v3370_v60   ;;  %v1403_v0 = vadd.f32 %v4140_v61, %v1402_v62  ;;  %v1659_v1 = vadd.f32 %v4140_v61, %v1658_v63  ;;  %v1404_v2 = vpop.f32.mrb[81].mxu0  ;;  %v1660_v3 = vpop.f32.mrb[81].mxu1 }
 0x1ac   : > { %v1405_v4 = vpop.f32.mrb[82].mxu0  ;;  %v1661_v5 = vpop.f32.mrb[82].mxu1 }
 0x1ad   : > { %v1406_v6 = vadd.f32 %v4140_v61, %v1405_v4  ;;  %v1662_v7 = vadd.f32 %v4140_v61, %v1661_v5  ;;  %v1407_v8 = vpop.f32.mrb[83].mxu0  ;;  %v1663_v9 = vpop.f32.mrb[83].mxu1  ;;  %v1793_v10 = vmax.f32 %v1403_v0, 0.0  ;;  %v1857_v11 = vmax.f32 %v1659_v1, 0.0 }
 0x1ae   : > { %v4322_v9 = vld [vmem:[%s4431_s2] ss:$0 sm:$0xff] }
 0x1af   : > { %v1794_v12 = vmax.f32 %v1406_v6, 0.0  ;;  %v1858_v13 = vmax.f32 %v1662_v7, 0.0 }
 0x1b1   : > { %v3215_v14 = vpack.c.bf16 %v1794_v12, %v1793_v10  ;;  %v3375_v15 = vpack.c.bf16 %v1858_v13, %v1857_v11 }
 0x1b2   : > { %v1410_v16 = vpop.f32.mrb[84].mxu0  ;;  %v1666_v17 = vpop.f32.mrb[84].mxu1 }
 0x1b3   : > { %3451 = vst [vmem:[%s4157_s18 + $0xa0] sm:$0xff] %v3215_v14   ;;  %3483 = vst [vmem:[%s4157_s18 + $0x1a0] sm:$0xff] %v3375_v15   ;;  %v1411_v18 = vadd.f32 %v4140_v61, %v1410_v16  ;;  %v1667_v19 = vadd.f32 %v4140_v61, %v1666_v17  ;;  %v1412_v20 = vpop.f32.mrb[85].mxu0  ;;  %v1668_v21 = vpop.f32.mrb[85].mxu1 }
 0x1b4   : > { %v1413_v22 = vpop.f32.mrb[86].mxu0  ;;  %v1669_v23 = vpop.f32.mrb[86].mxu1 }
 0x1b5   : > { %v1414_v24 = vadd.f32 %v4140_v61, %v1413_v22  ;;  %v1670_v25 = vadd.f32 %v4140_v61, %v1669_v23  ;;  %v1415_v26 = vpop.f32.mrb[87].mxu0  ;;  %v1671_v27 = vpop.f32.mrb[87].mxu1  ;;  %v1795_v28 = vmax.f32 %v1411_v18, 0.0  ;;  %v1859_v29 = vmax.f32 %v1667_v19, 0.0 }
 0x1b7   : > { %v1796_v30 = vmax.f32 %v1414_v24, 0.0  ;;  %v1860_v31 = vmax.f32 %v1670_v25, 0.0 }
 0x1b9   : > { %v3220_v32 = vpack.c.bf16 %v1796_v30, %v1795_v28  ;;  %v3380_v33 = vpack.c.bf16 %v1860_v31, %v1859_v29 }
 0x1ba   : > { %v1418_v34 = vpop.f32.mrb[88].mxu0  ;;  %v1674_v35 = vpop.f32.mrb[88].mxu1 }
 0x1bb   : > { %3452 = vst [vmem:[%s4157_s18 + $0xa8] sm:$0xff] %v3220_v32   ;;  %3484 = vst [vmem:[%s4157_s18 + $0x1a8] sm:$0xff] %v3380_v33   ;;  %v1419_v36 = vadd.f32 %v4140_v61, %v1418_v34  ;;  %v1675_v37 = vadd.f32 %v4140_v61, %v1674_v35  ;;  %v1420_v38 = vpop.f32.mrb[89].mxu0  ;;  %v1676_v39 = vpop.f32.mrb[89].mxu1 }
 0x1bc   : > { %v1421_v40 = vpop.f32.mrb[90].mxu0  ;;  %v1677_v41 = vpop.f32.mrb[90].mxu1 }
 0x1bd   : > { %v1422_v42 = vadd.f32 %v4140_v61, %v1421_v40  ;;  %v1678_v43 = vadd.f32 %v4140_v61, %v1677_v41  ;;  %v1423_v44 = vpop.f32.mrb[91].mxu0  ;;  %v1679_v45 = vpop.f32.mrb[91].mxu1  ;;  %v1797_v46 = vmax.f32 %v1419_v36, 0.0  ;;  %v1861_v47 = vmax.f32 %v1675_v37, 0.0 }
 0x1bf   : > { %v1798_v48 = vmax.f32 %v1422_v42, 0.0  ;;  %v1862_v49 = vmax.f32 %v1678_v43, 0.0 }
 0x1c1   : > { %v3225_v50 = vpack.c.bf16 %v1798_v48, %v1797_v46  ;;  %v3385_v51 = vpack.c.bf16 %v1862_v49, %v1861_v47 }
 0x1c2   : > { %v1426_v52 = vpop.f32.mrb[92].mxu0  ;;  %v1682_v53 = vpop.f32.mrb[92].mxu1 }
 0x1c3   : > { %3453 = vst [vmem:[%s4157_s18 + $0xb0] sm:$0xff] %v3225_v50   ;;  %3485 = vst [vmem:[%s4157_s18 + $0x1b0] sm:$0xff] %v3385_v51   ;;  %v1427_v54 = vadd.f32 %v4140_v61, %v1426_v52  ;;  %v1683_v55 = vadd.f32 %v4140_v61, %v1682_v53  ;;  %v1428_v56 = vpop.f32.mrb[93].mxu0  ;;  %v1684_v57 = vpop.f32.mrb[93].mxu1 }
 0x1c4   : > { %v1429_v58 = vpop.f32.mrb[94].mxu0  ;;  %v1685_v59 = vpop.f32.mrb[94].mxu1 }
 0x1c5   : > { %v1430_v60 = vadd.f32 %v4140_v61, %v1429_v58  ;;  %v1686_v62 = vadd.f32 %v4140_v61, %v1685_v59  ;;  %v1431_v63 = vpop.f32.mrb[95].mxu0  ;;  %v1687_v0 = vpop.f32.mrb[95].mxu1  ;;  %v1799_v1 = vmax.f32 %v1427_v54, 0.0  ;;  %v1863_v2 = vmax.f32 %v1683_v55, 0.0 }
 0x1c7   : > { %v1800_v3 = vmax.f32 %v1430_v60, 0.0  ;;  %v1864_v4 = vmax.f32 %v1686_v62, 0.0 }
 0x1c9   : > { %v3230_v5 = vpack.c.bf16 %v1800_v3, %v1799_v1  ;;  %v3390_v6 = vpack.c.bf16 %v1864_v4, %v1863_v2 }
 0x1ca   : > { %v1434_v7 = vpop.f32.mrb[96].mxu0  ;;  %v1690_v8 = vpop.f32.mrb[96].mxu1 }
 0x1cb   : > { %3454 = vst [vmem:[%s4157_s18 + $0xb8] sm:$0xff] %v3230_v5   ;;  %3486 = vst [vmem:[%s4157_s18 + $0x1b8] sm:$0xff] %v3390_v6   ;;  %v1435_v10 = vadd.f32 %v4322_v9, %v1434_v7  ;;  %v1691_v61 = vadd.f32 %v4322_v9, %v1690_v8  ;;  %v1436_v11 = vpop.f32.mrb[97].mxu0  ;;  %v1692_v12 = vpop.f32.mrb[97].mxu1 }
 0x1cc   : > { %v1437_v13 = vpop.f32.mrb[98].mxu0  ;;  %v1693_v14 = vpop.f32.mrb[98].mxu1 }
 0x1cd   : > { %v1438_v15 = vadd.f32 %v4322_v9, %v1437_v13  ;;  %v1694_v16 = vadd.f32 %v4322_v9, %v1693_v14  ;;  %v1439_v17 = vpop.f32.mrb[99].mxu0  ;;  %v1695_v18 = vpop.f32.mrb[99].mxu1  ;;  %v1801_v19 = vmax.f32 %v1435_v10, 0.0  ;;  %v1865_v20 = vmax.f32 %v1691_v61, 0.0 }
 0x1cf   : > { %v1802_v21 = vmax.f32 %v1438_v15, 0.0  ;;  %v1866_v22 = vmax.f32 %v1694_v16, 0.0 }
 0x1d1   : > { %v3235_v23 = vpack.c.bf16 %v1802_v21, %v1801_v19  ;;  %v3395_v24 = vpack.c.bf16 %v1866_v22, %v1865_v20 }
 0x1d2   : > { %v1442_v25 = vpop.f32.mrb[100].mxu0  ;;  %v1698_v26 = vpop.f32.mrb[100].mxu1 }
 0x1d3   : > { %3455 = vst [vmem:[%s4157_s18 + $0xc0] sm:$0xff] %v3235_v23   ;;  %3487 = vst [vmem:[%s4157_s18 + $0x1c0] sm:$0xff] %v3395_v24   ;;  %v1443_v27 = vadd.f32 %v4322_v9, %v1442_v25  ;;  %v1699_v28 = vadd.f32 %v4322_v9, %v1698_v26  ;;  %v1444_v29 = vpop.f32.mrb[101].mxu0  ;;  %v1700_v30 = vpop.f32.mrb[101].mxu1 }
 0x1d4   : > { %v1445_v31 = vpop.f32.mrb[102].mxu0  ;;  %v1701_v32 = vpop.f32.mrb[102].mxu1 }
 0x1d5   : > { %v1446_v33 = vadd.f32 %v4322_v9, %v1445_v31  ;;  %v1702_v34 = vadd.f32 %v4322_v9, %v1701_v32  ;;  %v1447_v35 = vpop.f32.mrb[103].mxu0  ;;  %v1703_v36 = vpop.f32.mrb[103].mxu1  ;;  %v1803_v37 = vmax.f32 %v1443_v27, 0.0  ;;  %v1867_v38 = vmax.f32 %v1699_v28, 0.0 }
 0x1d7   : > { %v1804_v39 = vmax.f32 %v1446_v33, 0.0  ;;  %v1868_v40 = vmax.f32 %v1702_v34, 0.0 }
 0x1d9   : > { %v3240_v41 = vpack.c.bf16 %v1804_v39, %v1803_v37  ;;  %v3400_v42 = vpack.c.bf16 %v1868_v40, %v1867_v38 }
 0x1da   : > { %v1450_v43 = vpop.f32.mrb[104].mxu0  ;;  %v1706_v44 = vpop.f32.mrb[104].mxu1 }
 0x1db   : > { %3456 = vst [vmem:[%s4157_s18 + $0xc8] sm:$0xff] %v3240_v41   ;;  %3488 = vst [vmem:[%s4157_s18 + $0x1c8] sm:$0xff] %v3400_v42   ;;  %v1451_v45 = vadd.f32 %v4322_v9, %v1450_v43  ;;  %v1707_v46 = vadd.f32 %v4322_v9, %v1706_v44  ;;  %v1452_v47 = vpop.f32.mrb[105].mxu0  ;;  %v1708_v48 = vpop.f32.mrb[105].mxu1 }
 0x1dc   : > { %v1453_v49 = vpop.f32.mrb[106].mxu0  ;;  %v1709_v50 = vpop.f32.mrb[106].mxu1 }
 0x1dd   : > { %v1454_v51 = vadd.f32 %v4322_v9, %v1453_v49  ;;  %v1710_v52 = vadd.f32 %v4322_v9, %v1709_v50  ;;  %v1455_v53 = vpop.f32.mrb[107].mxu0  ;;  %v1711_v54 = vpop.f32.mrb[107].mxu1  ;;  %v1805_v55 = vmax.f32 %v1451_v45, 0.0  ;;  %v1869_v56 = vmax.f32 %v1707_v46, 0.0 }
 0x1df   : > { %v1806_v57 = vmax.f32 %v1454_v51, 0.0  ;;  %v1870_v58 = vmax.f32 %v1710_v52, 0.0 }
 0x1e1   : > { %v3245_v59 = vpack.c.bf16 %v1806_v57, %v1805_v55  ;;  %v3405_v60 = vpack.c.bf16 %v1870_v58, %v1869_v56 }
 0x1e2   : > { %v1458_v62 = vpop.f32.mrb[108].mxu0  ;;  %v1714_v63 = vpop.f32.mrb[108].mxu1 }
 0x1e3   : > { %3457 = vst [vmem:[%s4157_s18 + $0xd0] sm:$0xff] %v3245_v59   ;;  %3489 = vst [vmem:[%s4157_s18 + $0x1d0] sm:$0xff] %v3405_v60   ;;  %v1459_v0 = vadd.f32 %v4322_v9, %v1458_v62  ;;  %v1715_v1 = vadd.f32 %v4322_v9, %v1714_v63  ;;  %v1460_v2 = vpop.f32.mrb[109].mxu0  ;;  %v1716_v3 = vpop.f32.mrb[109].mxu1 }
 0x1e4   : > { %v1461_v4 = vpop.f32.mrb[110].mxu0  ;;  %v1717_v5 = vpop.f32.mrb[110].mxu1 }
 0x1e5   : > { %v1462_v6 = vadd.f32 %v4322_v9, %v1461_v4  ;;  %v1718_v7 = vadd.f32 %v4322_v9, %v1717_v5  ;;  %v1463_v8 = vpop.f32.mrb[111].mxu0  ;;  %v1719_v10 = vpop.f32.mrb[111].mxu1  ;;  %v1807_v61 = vmax.f32 %v1459_v0, 0.0  ;;  %v1871_v11 = vmax.f32 %v1715_v1, 0.0 }
 0x1e7   : > { %v1808_v12 = vmax.f32 %v1462_v6, 0.0  ;;  %v1872_v13 = vmax.f32 %v1718_v7, 0.0 }
 0x1e9   : > { %v3250_v14 = vpack.c.bf16 %v1808_v12, %v1807_v61  ;;  %v3410_v15 = vpack.c.bf16 %v1872_v13, %v1871_v11 }
 0x1ea   : > { %v1466_v16 = vpop.f32.mrb[112].mxu0  ;;  %v1722_v17 = vpop.f32.mrb[112].mxu1 }
 0x1eb   : > { %3458 = vst [vmem:[%s4157_s18 + $0xd8] sm:$0xff] %v3250_v14   ;;  %3490 = vst [vmem:[%s4157_s18 + $0x1d8] sm:$0xff] %v3410_v15   ;;  %v1467_v18 = vadd.f32 %v4322_v9, %v1466_v16  ;;  %v1723_v19 = vadd.f32 %v4322_v9, %v1722_v17  ;;  %v1468_v20 = vpop.f32.mrb[113].mxu0  ;;  %v1724_v21 = vpop.f32.mrb[113].mxu1 }
 0x1ec   : > { %v1469_v22 = vpop.f32.mrb[114].mxu0  ;;  %v1725_v23 = vpop.f32.mrb[114].mxu1 }
 0x1ed   : > { %v1470_v24 = vadd.f32 %v4322_v9, %v1469_v22  ;;  %v1726_v25 = vadd.f32 %v4322_v9, %v1725_v23  ;;  %v1471_v26 = vpop.f32.mrb[115].mxu0  ;;  %v1727_v27 = vpop.f32.mrb[115].mxu1  ;;  %v1809_v28 = vmax.f32 %v1467_v18, 0.0  ;;  %v1873_v29 = vmax.f32 %v1723_v19, 0.0 }
 0x1ef   : > { %v1810_v30 = vmax.f32 %v1470_v24, 0.0  ;;  %v1874_v31 = vmax.f32 %v1726_v25, 0.0 }
 0x1f1   : > { %v3255_v32 = vpack.c.bf16 %v1810_v30, %v1809_v28  ;;  %v3415_v33 = vpack.c.bf16 %v1874_v31, %v1873_v29 }
 0x1f2   : > { %v1474_v34 = vpop.f32.mrb[116].mxu0  ;;  %v1730_v35 = vpop.f32.mrb[116].mxu1 }
 0x1f3   : > { %3459 = vst [vmem:[%s4157_s18 + $0xe0] sm:$0xff] %v3255_v32   ;;  %3491 = vst [vmem:[%s4157_s18 + $0x1e0] sm:$0xff] %v3415_v33   ;;  %v1475_v36 = vadd.f32 %v4322_v9, %v1474_v34  ;;  %v1731_v37 = vadd.f32 %v4322_v9, %v1730_v35  ;;  %v1476_v38 = vpop.f32.mrb[117].mxu0  ;;  %v1732_v39 = vpop.f32.mrb[117].mxu1 }
 0x1f4   : > { %v1477_v40 = vpop.f32.mrb[118].mxu0  ;;  %v1733_v41 = vpop.f32.mrb[118].mxu1 }
 0x1f5   : > { %v1478_v42 = vadd.f32 %v4322_v9, %v1477_v40  ;;  %v1734_v43 = vadd.f32 %v4322_v9, %v1733_v41  ;;  %v1479_v44 = vpop.f32.mrb[119].mxu0  ;;  %v1735_v45 = vpop.f32.mrb[119].mxu1  ;;  %v1811_v46 = vmax.f32 %v1475_v36, 0.0  ;;  %v1875_v47 = vmax.f32 %v1731_v37, 0.0 }
 0x1f7   : > { %v1812_v48 = vmax.f32 %v1478_v42, 0.0  ;;  %v1876_v49 = vmax.f32 %v1734_v43, 0.0 }
 0x1f9   : > { %v3260_v50 = vpack.c.bf16 %v1812_v48, %v1811_v46  ;;  %v3420_v51 = vpack.c.bf16 %v1876_v49, %v1875_v47 }
 0x1fa   : > { %v1482_v52 = vpop.f32.mrb[120].mxu0  ;;  %v1738_v53 = vpop.f32.mrb[120].mxu1 }
 0x1fb   : > { %3460 = vst [vmem:[%s4157_s18 + $0xe8] sm:$0xff] %v3260_v50   ;;  %3492 = vst [vmem:[%s4157_s18 + $0x1e8] sm:$0xff] %v3420_v51   ;;  %v1483_v54 = vadd.f32 %v4322_v9, %v1482_v52  ;;  %v1739_v55 = vadd.f32 %v4322_v9, %v1738_v53  ;;  %v1484_v56 = vpop.f32.mrb[121].mxu0  ;;  %v1740_v57 = vpop.f32.mrb[121].mxu1 }
 0x1fc   : > { %v1485_v58 = vpop.f32.mrb[122].mxu0  ;;  %v1741_v59 = vpop.f32.mrb[122].mxu1 }
 0x1fd   : > { %v1486_v60 = vadd.f32 %v4322_v9, %v1485_v58  ;;  %v1742_v62 = vadd.f32 %v4322_v9, %v1741_v59  ;;  %v1487_v63 = vpop.f32.mrb[123].mxu0  ;;  %v1743_v0 = vpop.f32.mrb[123].mxu1  ;;  %v1813_v1 = vmax.f32 %v1483_v54, 0.0  ;;  %v1877_v2 = vmax.f32 %v1739_v55, 0.0 }
 0x1ff   : > { %v1814_v3 = vmax.f32 %v1486_v60, 0.0  ;;  %v1878_v4 = vmax.f32 %v1742_v62, 0.0 }
 0x201   : > { %v3265_v5 = vpack.c.bf16 %v1814_v3, %v1813_v1  ;;  %v3425_v6 = vpack.c.bf16 %v1878_v4, %v1877_v2 }
 0x202   : > { %v1490_v7 = vpop.f32.mrb[124].mxu0  ;;  %v1746_v8 = vpop.f32.mrb[124].mxu1 }
 0x203   : > { %3461 = vst [vmem:[%s4157_s18 + $0xf0] sm:$0xff] %v3265_v5   ;;  %3493 = vst [vmem:[%s4157_s18 + $0x1f0] sm:$0xff] %v3425_v6   ;;  %v1491_v10 = vadd.f32 %v4322_v9, %v1490_v7  ;;  %v1747_v61 = vadd.f32 %v4322_v9, %v1746_v8  ;;  %v1492_v11 = vpop.f32.mrb[125].mxu0  ;;  %v1748_v12 = vpop.f32.mrb[125].mxu1 }
 0x204   : > { %v1493_v13 = vpop.f32.mrb[126].mxu0  ;;  %v1749_v14 = vpop.f32.mrb[126].mxu1 }
 0x205   : > { %v1494_v15 = vadd.f32 %v4322_v9, %v1493_v13  ;;  %v1750_v16 = vadd.f32 %v4322_v9, %v1749_v14  ;;  %v1495_v17 = vpop.f32.mrb[127].mxu0  ;;  %v1751_v18 = vpop.f32.mrb[127].mxu1  ;;  %v1815_v19 = vmax.f32 %v1491_v10, 0.0  ;;  %v1879_v20 = vmax.f32 %v1747_v61, 0.0 }
 0x207   : > { %v1816_v21 = vmax.f32 %v1494_v15, 0.0  ;;  %v1880_v22 = vmax.f32 %v1750_v16, 0.0 }
 0x209   : > { %v3270_v9 = vpack.c.bf16 %v1816_v21, %v1815_v19  ;;  %v3430_v23 = vpack.c.bf16 %v1880_v22, %v1879_v20 }
 0x20b   : > { %3462 = vst [vmem:[%s4157_s18 + $0xf8] sm:$0xff] %v3270_v9   ;;  %3494 = vst [vmem:[%s4157_s18 + $0x1f8] sm:$0xff] %v3430_v23  }
 0x20c   : > { %3790 = shalt.err (!%p3787_p5)
}
 0x20d   : > { %s3791_s6 = scalar_lea.hbm %s4375_s28, 8192  ;;  %s3795_s9 = scalar_lea.hbm %s4432_s3, 16384 }
 0x20e   : > { %p3792_p6 = scmp.ne.s32.totalorder %s4375_s28, %s3791_s6  ;;  %p3796_p10 = scmp.lt.u32.totalorder %s4375_s28, %s4432_s3 }
 0x20f   : > { %p3797_p11 = scmp.lt.u32.totalorder %s3795_s9, %s3791_s6  ;;  %p3799_p13 = scmp.lt.u32.totalorder %s3791_s6, %s4375_s28 }
 0x210   : > { %p3793_p7 = pnand %p3792_p6, %p3922_p4 }
 0x211   : > { %p3798_p12 = por %p3797_p11, %p3796_p10 }
 0x212   : > { %p3794_p9 = pneg %p3793_p7 }
 0x213   : > { %p3800_p0 = por %p3799_p13, %p3798_p12 }
 0x215   : > { %p3801_p1 = pnand %p3800_p0, %p3794_p9 }
 0x217   : > { %3804 = shalt.err (!%p3801_p1)
}
 0x218   : > { %s3860_s11 = smov 64   ;;  %s3861_s19 = smov 4  }
 0x219   : > { %3515 = dma.vmem_to_hbm [thread:$0]  (%p3922_p4), %s4377_s23, 8192, %s4375_s28, %s4383_s15, %s3860_s11, %s3860_s11, %s3861_s19  }
 0x21a PF: > { %p3521_p2 = scmp.ge.s32.totalorder %s3855_s17, 2  ;;  %s2551_s21 = sand.u32 1, %s3835_s12  }
 0x21b   : > { %s2552_s26 = scalar_lea.sflag [#allocation3], %s2551_s21 }
 0x21c   : > { %p3518_p3 = pnand %p3521_p2, %p3929_p8 }
 0x21e   : > { %3830 = dma.done.wait (!%p3518_p3), %s2552_s26, 8192  }
 0x21f   : > { %3832 = vsyncadd (!%p3518_p3), %s2552_s26, 4294959104  ;;  %s16_s17 = sadd.s32 1, %s3855_s17   ;;  %s4435_s12 = smov %s3839_s13 }
 0x220   : > { %p13_p5 = scmp.ge.s32.totalorder %s16_s17, 4   ;;  %s4436_s13 = smov %s3843_s14 }
 0x221   : > { %s4437_s14 = smov %s3935_s25  ;;  %s4438_s15 = smov %s3851_s16 }
 0x222   : > { %s4439_s16 = smov %s4441_s20  ;;  %15 = sbr.rel (!%p13_p5) target bundleno = 4 (0x4), region = 73 }
 0x229   :  { %2557 = vsyncpa [#allocation3], 1 }
 0x22a   :  { %2559 = vsyncpa [#allocation3 + $0x1], 1 }

</bundles_post_ra>
